<compile_context>
chip_gen: v6e
topology: v6e:2x2x1
jax: 0.10.0
libtpu: 0.0.40
codegen_flags: <defaults>
</compile_context>

<pallas_src>
import functools

import numpy as np
import jax
import jax.numpy as jnp
from jax import lax
from jax.experimental import pallas as pl
from jax.experimental.pallas import tpu as pltpu


def _cdiv(a, b):
    return -(-a // b)


def _round_up(a, b):
    return _cdiv(a, b) * b


# ----------------------------- Pallas kernel ------------------------------ #
def _wn_conv_kernel(x_ref, v_ref, g_ref, b_ref, out_ref, p_ref, w_ref, s_ref,
                    *, kh, kw, cin, th, wout, stride):
    """One (image, row-tile) grid step.

    x_ref:   (Hp, Cin, Wp) bf16  whole zero-padded image; its block index only
                                 changes with the image axis, so Pallas DMAs it
                                 once per image and it stays resident.
    v_ref:   (Cout, K) f32   unnormalized direction, K ordered (kh, kw, cin)
    g_ref:   (Cout, 1) f32   weight-norm magnitude
    b_ref:   (Cout, 1) f32   bias
    out_ref: (Cout, TM) f32  TM = TH*Wout output pixels of this row tile
    p_ref:   (K, TM)   bf16  scratch: fused-im2col patch tile
    w_ref:   (Cout, K) bf16  scratch: v cast once per image sweep (MXU operand)
    s_ref:   (Cout, 1) f32   scratch: g * rsqrt(sum(v*v)) (EUP rsqrt)
    """
    # Hoist the weight-norm scale and the bf16 cast of v out of the row sweep.
    # Re-done at the start of every image sweep (Cout*K elements, negligible)
    # so it is also correct when the batch axis is split across v7x's two TCs.
    @pl.when(pl.program_id(1) == 0)
    def _init():
        v = v_ref[...]
        # No eps, matching torch.nn.utils.weight_norm (NaN if a v row is all 0).
        s_ref[...] = g_ref[...] * lax.rsqrt(jnp.sum(v * v, axis=1, keepdims=True))
        w_ref[...] = v.astype(w_ref.dtype)

    # Fused im2col: fill the (K, TM) patch tile straight from the resident
    # padded image.  Every move is a plain 2-D slice load/store (no in-register
    # reshapes), so it lowers to simple (masked) VMEM copies.
    row0 = pl.program_id(1) * (th * stride)
    for r in range(th):                      # output row within this tile
        for i in range(kh):                  # kernel row
            row = row0 + r * stride + i
            for j in range(kw):              # kernel col
                if stride == 1:
                    win = x_ref[row, :, pl.ds(j, wout)]            # (Cin, Wout)
                else:
                    # TODO(synk): stride > 1 takes a strided lane slice; RealNVP
                    # only uses stride=1, so this path is not exercised here.
                    win = x_ref[row, :, pl.ds(j, wout, stride)]
                p_ref[(i * kw + j) * cin:(i * kw + j + 1) * cin,
                      r * wout:(r + 1) * wout] = win

    # Single full-depth contraction (K = KH*KW*Cin) on the MXU, f32 accumulate;
    # weight-norm scale applied post-matmul, fused with the bias add.
    acc = jnp.dot(w_ref[...], p_ref[...], preferred_element_type=jnp.float32)
    out_ref[...] = (acc * s_ref[...] + b_ref[...]).astype(out_ref.dtype)


# ------------------------------ tile heuristics ----------------------------- #
def _pick_row_tile(n, hout, wout, k, cout, *, tm_target=2048, min_steps=4):
    """Output rows computed per grid step (TH).

    TH must divide Hout and TH*Wout must be lane-aligned (%128 == 0) unless
    TH == Hout (block == full array dim).  Prefer TH*Wout >= tm_target to
    amortize the ~0.35 us per-step overhead, keep the per-step scratch modest
    (v7x 64 MiB VMEM), and keep >= min_steps total grid steps so the BlockSpec
    pipeline has work to overlap.
    """
    valid = [t for t in range(1, hout + 1)
             if hout % t == 0 and ((t * wout) % 128 == 0 or t == hout)]

    def scratch_bytes(t):
        return k * t * wout * 2 + 2 * cout * t * wout * 4

    ok = [t for t in valid if scratch_bytes(t) <= 12 * 2 ** 20] or valid[:1]
    th = next((t for t in ok if t * wout >= tm_target), ok[-1])
    while n * (hout // th) < min_steps:
        smaller = [t for t in ok if t < th]
        if not smaller:
            break
        th = smaller[-1]
    return th


def _vmem_limit_bytes(cin, hp, wp, cout, k, tm):
    lane = lambda d: _round_up(d, 128)
    sub = lambda d: _round_up(d, 8)
    img = hp * sub(cin) * lane(wp) * 2            # bf16 (Hp, Cin, Wp) image block
    patch = sub(k) * lane(tm) * 2                 # fused-im2col scratch
    otile = sub(cout) * lane(tm) * 4              # f32 output tile
    wts = sub(cout) * (lane(k) * 6 + lane(1) * 12)  # v(f32)+w(bf16)+g/b/s
    need = 2 * img + patch + 2 * otile + 2 * wts  # in/out double-buffered
    # Headroom for compiler temporaries; stay under v7x's 64 MiB physical VMEM.
    return int(min(max(2 * need, 32 * 2 ** 20), 48 * 2 ** 20))


# ------------------------------ JAX wrapper -------------------------------- #
def weight_norm_conv2d(x_nchw, v, g, bias, *, stride=1, padding=0):
    """x_nchw: (N, Cin, H, W); v: (Cout, Cin, KH, KW); g, bias: (Cout,)."""
    n, cin, h, w = x_nchw.shape
    cout, _, kh, kw = v.shape
    k = cin * kh * kw
    hp, wp = h + 2 * padding, w + 2 * padding
    hout = (hp - kh) // stride + 1
    wout = (wp - kw) // stride + 1

    # Single wrapper pass over x: bf16 cast + move H in front of C (so the
    # kernel's patch loads are contiguous (Cin, Wout) sublane tiles) + zero-pad.
    xpad = jnp.pad(
        jnp.transpose(x_nchw.astype(jnp.bfloat16), (0, 2, 1, 3)),
        ((0, 0), (padding, padding), (0, 0), (padding, padding)))

    # K ordering (kh, kw, cin) matches the in-kernel patch-row layout.
    vmat = jnp.transpose(v, (0, 2, 3, 1)).reshape(cout, k).astype(jnp.float32)
    g2 = g.reshape(cout, 1).astype(jnp.float32)
    b2 = bias.reshape(cout, 1).astype(jnp.float32)

    th = _pick_row_tile(n, hout, wout, k, cout)
    hb = hout // th
    tm = th * wout

    kernel = functools.partial(_wn_conv_kernel, kh=kh, kw=kw, cin=cin,
                               th=th, wout=wout, stride=stride)

    out = pl.pallas_call(
        kernel,
        out_shape=jax.ShapeDtypeStruct((n, cout, hout * wout), jnp.float32),
        grid_spec=pltpu.PrefetchScalarGridSpec(
            num_scalar_prefetch=0,
            grid=(n, hb),
            in_specs=[
                # Whole padded image: block index depends only on the image
                # axis -> fetched once per image, resident across the row sweep
                # while the next image is prefetched.
                pl.BlockSpec((None, hp, cin, wp), lambda ni, hi: (ni, 0, 0, 0)),
                # Constant-index operands: DMA'd once (index never changes).
                # Double-buffer overhead is ~Cout*K*6 B, so pl.Buffered(1)
                # plumbing is deliberately skipped.
                pl.BlockSpec((cout, k), lambda ni, hi: (0, 0)),
                pl.BlockSpec((cout, 1), lambda ni, hi: (0, 0)),
                pl.BlockSpec((cout, 1), lambda ni, hi: (0, 0)),
            ],
            # Lane-dense (Cout, TM) tile written at its final offset in the
            # (N, Cout, Hout*Wout) output -> no post-kernel transpose pass.
            out_specs=pl.BlockSpec((None, cout, tm), lambda ni, hi: (ni, 0, hi)),
            scratch_shapes=[
                pltpu.VMEM((k, tm), jnp.bfloat16),    # fused-im2col patch tile
                pltpu.VMEM((cout, k), jnp.bfloat16),  # cached bf16 weight
                pltpu.VMEM((cout, 1), jnp.float32),   # cached weight-norm scale
            ],
        ),
        compiler_params=pltpu.CompilerParams(
            # Batch axis "parallel": v7x's two TensorCores split the images
            # automatically; on single-core v5e/v6e it is a no-op (no explicit
            # 2-way split / duplicated tile work any more).
            dimension_semantics=("parallel", "arbitrary"),
            vmem_limit_bytes=_vmem_limit_bytes(cin, hp, wp, cout, k, tm),
        ),
    )(xpad, vmat, g2, b2)

    # Minor-dim split only: metadata reshape, no extra HBM pass.
    return out.reshape(n, cout, hout, wout)


# ------------------------------ reference ---------------------------------- #
def _reference(x_nchw, v, g, bias, stride, padding):
    norm = jnp.sqrt(jnp.sum(v * v, axis=(1, 2, 3), keepdims=True))
    w = v * (g.reshape(-1, 1, 1, 1) / norm)
    y = lax.conv_general_dilated(
        x_nchw, w, window_strides=(stride, stride),
        padding=[(padding, padding), (padding, padding)],
        dimension_numbers=("NCHW", "OIHW", "NCHW"),
    )
    return y + bias.reshape(1, -1, 1, 1)


# --------------------------------- main ------------------------------------ #
if __name__ == "__main__":
    # WeightNormConv2d(in_channels=4, out_channels=8, kernel_size=3,
    #                  stride=1, padding=1, bias=True)
    N, Cin, H, W = 2, 4, 16, 16
    Cout, KH, KW = 8, 3, 3
    stride, padding = 1, 1

    key = jax.random.PRNGKey(0)
    kx, kv, kg, kb = jax.random.split(key, 4)
    x = jax.random.normal(kx, (N, Cin, H, W), dtype=jnp.float32)
    v = jax.random.normal(kv, (Cout, Cin, KH, KW), dtype=jnp.float32) * 0.1
    g = jax.random.normal(kg, (Cout,), dtype=jnp.float32) * 0.5 + 1.0
    b = jax.random.normal(kb, (Cout,), dtype=jnp.float32) * 0.1

    y = weight_norm_conv2d(x, v, g, b, stride=stride, padding=padding)
    y = jax.block_until_ready(y)

    y_ref = jax.block_until_ready(_reference(x, v, g, b, stride, padding))
    assert y.shape == (N, Cout, H, W), y.shape
    # bf16 MXU operands vs f32 XLA reference -> slightly looser tolerance.
    assert np.allclose(np.asarray(y), np.asarray(y_ref), rtol=2e-2, atol=2e-2), (
        "mismatch vs reference"
    )
    print("KERNEL_OK")
</pallas_src>

<mosaic_0001>
module attributes {stable_mosaic.version = 11 : i64} {
  func.func @_wn_conv_kernel(%arg0: i32, %arg1: i32, %arg2: memref<1x18x4x18xbf16, #tpu.memory_space<vmem>>, %arg3: memref<8x36xf32, #tpu.memory_space<vmem>>, %arg4: memref<8x1xf32, #tpu.memory_space<vmem>>, %arg5: memref<8x1xf32, #tpu.memory_space<vmem>>, %arg6: memref<1x8x128xf32, #tpu.memory_space<vmem>>, %arg7: memref<36x128xbf16, #tpu.memory_space<vmem>>, %arg8: memref<8x36xbf16, #tpu.memory_space<vmem>>, %arg9: memref<8x1xf32, #tpu.memory_space<vmem>>) attributes {dimension_semantics = [#tpu.dimension_semantics<parallel>, #tpu.dimension_semantics<arbitrary>], iteration_bounds = array<i64: 2, 2>, scalar_prefetch = 0 : i64, scratch_operands = 3 : i64, tpu.core_type = #tpu.core_type<tc>, window_params = [{transform_indices = @transform_0, window_bounds = array<i64: 1, 18, 4, 18>}, {pipeline_mode = #tpu.pipeline_mode<synchronous>, transform_indices = @transform_1, window_bounds = array<i64: 8, 36>}, {pipeline_mode = #tpu.pipeline_mode<synchronous>, transform_indices = @transform_2, window_bounds = array<i64: 8, 1>}, {pipeline_mode = #tpu.pipeline_mode<synchronous>, transform_indices = @transform_3, window_bounds = array<i64: 8, 1>}, {transform_indices = @transform_4, window_bounds = array<i64: 1, 8, 128>}]} {
    %c0_i32 = arith.constant 0 : i32
    %0 = arith.cmpi eq, %arg1, %c0_i32 : i32
    %1 = arith.extui %0 : i1 to i32
    %c0_i32_0 = arith.constant 0 : i32
    %2 = arith.cmpi ne, %1, %c0_i32_0 : i32
    scf.if %2 {
      %c0_397 = arith.constant 0 : index
      %c0_398 = arith.constant 0 : index
      %352 = vector.load %arg3[%c0_397, %c0_398] : memref<8x36xf32, #tpu.memory_space<vmem>>, vector<8x36xf32>
      %c0_399 = arith.constant 0 : index
      %c0_400 = arith.constant 0 : index
      %353 = vector.load %arg4[%c0_399, %c0_400] : memref<8x1xf32, #tpu.memory_space<vmem>>, vector<8x1xf32>
      %354 = arith.mulf %352, %352 : vector<8x36xf32>
      %cst_401 = arith.constant dense<0.000000e+00> : vector<8xf32>
      %355 = vector.multi_reduction <add>, %354, %cst_401 [1] : vector<8x36xf32> to vector<8xf32>
      %356 = vector.shape_cast %355 : vector<8xf32> to vector<8x1xf32>
      %357 = math.rsqrt %356 : vector<8x1xf32>
      %358 = arith.mulf %353, %357 : vector<8x1xf32>
      %c0_402 = arith.constant 0 : index
      %c0_403 = arith.constant 0 : index
      %359 = vector.load %arg9[%c0_402, %c0_403] : memref<8x1xf32, #tpu.memory_space<vmem>>, vector<8x1xf32>
      tpu.vector_store %arg9[%c0_402, %c0_403], %358 {strides = array<i32>} : memref<8x1xf32, #tpu.memory_space<vmem>>, vector<8x1xf32>,
      %360 = arith.truncf %352 : vector<8x36xf32> to vector<8x36xbf16>
      %c0_404 = arith.constant 0 : index
      %c0_405 = arith.constant 0 : index
      %361 = vector.load %arg8[%c0_404, %c0_405] : memref<8x36xbf16, #tpu.memory_space<vmem>>, vector<8x36xbf16>
      tpu.vector_store %arg8[%c0_404, %c0_405], %360 {strides = array<i32>} : memref<8x36xbf16, #tpu.memory_space<vmem>>, vector<8x36xbf16>,
    } else {
    }
    %c8_i32 = arith.constant 8 : i32
    %3 = arith.muli %arg1, %c8_i32 : i32
    %c0_i32_1 = arith.constant 0 : i32
    %4 = arith.addi %3, %c0_i32_1 : i32
    %c0_i32_2 = arith.constant 0 : i32
    %5 = arith.addi %4, %c0_i32_2 : i32
    %c0 = arith.constant 0 : index
    %6 = arith.index_cast %5 : i32 to index
    %c0_3 = arith.constant 0 : index
    %c0_4 = arith.constant 0 : index
    %7 = vector.load %arg2[%c0, %6, %c0_3, %c0_4] : memref<1x18x4x18xbf16, #tpu.memory_space<vmem>>, vector<1x1x4x16xbf16>
    %8 = vector.shape_cast %7 : vector<1x1x4x16xbf16> to vector<4x16xbf16>
    %c0_5 = arith.constant 0 : index
    %c0_6 = arith.constant 0 : index
    %9 = vector.load %arg7[%c0_5, %c0_6] : memref<36x128xbf16, #tpu.memory_space<vmem>>, vector<4x16xbf16>
    tpu.vector_store %arg7[%c0_5, %c0_6], %8 {strides = array<i32>} : memref<36x128xbf16, #tpu.memory_space<vmem>>, vector<4x16xbf16>,
    %c0_7 = arith.constant 0 : index
    %10 = arith.index_cast %5 : i32 to index
    %c0_8 = arith.constant 0 : index
    %c1 = arith.constant 1 : index
    %11 = vector.load %arg2[%c0_7, %10, %c0_8, %c1] : memref<1x18x4x18xbf16, #tpu.memory_space<vmem>>, vector<1x1x4x16xbf16>
    %12 = vector.shape_cast %11 : vector<1x1x4x16xbf16> to vector<4x16xbf16>
    %c4 = arith.constant 4 : index
    %c0_9 = arith.constant 0 : index
    %13 = vector.load %arg7[%c4, %c0_9] : memref<36x128xbf16, #tpu.memory_space<vmem>>, vector<4x16xbf16>
    tpu.vector_store %arg7[%c4, %c0_9], %12 {strides = array<i32>} : memref<36x128xbf16, #tpu.memory_space<vmem>>, vector<4x16xbf16>,
    %c0_10 = arith.constant 0 : index
    %14 = arith.index_cast %5 : i32 to index
    %c0_11 = arith.constant 0 : index
    %c2 = arith.constant 2 : index
    %15 = vector.load %arg2[%c0_10, %14, %c0_11, %c2] : memref<1x18x4x18xbf16, #tpu.memory_space<vmem>>, vector<1x1x4x16xbf16>
    %16 = vector.shape_cast %15 : vector<1x1x4x16xbf16> to vector<4x16xbf16>
    %c8 = arith.constant 8 : index
    %c0_12 = arith.constant 0 : index
    %17 = vector.load %arg7[%c8, %c0_12] : memref<36x128xbf16, #tpu.memory_space<vmem>>, vector<4x16xbf16>
    tpu.vector_store %arg7[%c8, %c0_12], %16 {strides = array<i32>} : memref<36x128xbf16, #tpu.memory_space<vmem>>, vector<4x16xbf16>,
    %c0_i32_13 = arith.constant 0 : i32
    %18 = arith.addi %3, %c0_i32_13 : i32
    %c1_i32 = arith.constant 1 : i32
    %19 = arith.addi %18, %c1_i32 : i32
    %c0_14 = arith.constant 0 : index
    %20 = arith.index_cast %19 : i32 to index
    %c0_15 = arith.constant 0 : index
    %c0_16 = arith.constant 0 : index
    %21 = vector.load %arg2[%c0_14, %20, %c0_15, %c0_16] : memref<1x18x4x18xbf16, #tpu.memory_space<vmem>>, vector<1x1x4x16xbf16>
    %22 = vector.shape_cast %21 : vector<1x1x4x16xbf16> to vector<4x16xbf16>
    %c12 = arith.constant 12 : index
    %c0_17 = arith.constant 0 : index
    %23 = vector.load %arg7[%c12, %c0_17] : memref<36x128xbf16, #tpu.memory_space<vmem>>, vector<4x16xbf16>
    tpu.vector_store %arg7[%c12, %c0_17], %22 {strides = array<i32>} : memref<36x128xbf16, #tpu.memory_space<vmem>>, vector<4x16xbf16>,
    %c0_18 = arith.constant 0 : index
    %24 = arith.index_cast %19 : i32 to index
    %c0_19 = arith.constant 0 : index
    %c1_20 = arith.constant 1 : index
    %25 = vector.load %arg2[%c0_18, %24, %c0_19, %c1_20] : memref<1x18x4x18xbf16, #tpu.memory_space<vmem>>, vector<1x1x4x16xbf16>
    %26 = vector.shape_cast %25 : vector<1x1x4x16xbf16> to vector<4x16xbf16>
    %c16 = arith.constant 16 : index
    %c0_21 = arith.constant 0 : index
    %27 = vector.load %arg7[%c16, %c0_21] : memref<36x128xbf16, #tpu.memory_space<vmem>>, vector<4x16xbf16>
    tpu.vector_store %arg7[%c16, %c0_21], %26 {strides = array<i32>} : memref<36x128xbf16, #tpu.memory_space<vmem>>, vector<4x16xbf16>,
    %c0_22 = arith.constant 0 : index
    %28 = arith.index_cast %19 : i32 to index
    %c0_23 = arith.constant 0 : index
    %c2_24 = arith.constant 2 : index
    %29 = vector.load %arg2[%c0_22, %28, %c0_23, %c2_24] : memref<1x18x4x18xbf16, #tpu.memory_space<vmem>>, vector<1x1x4x16xbf16>
    %30 = vector.shape_cast %29 : vector<1x1x4x16xbf16> to vector<4x16xbf16>
    %c20 = arith.constant 20 : index
    %c0_25 = arith.constant 0 : index
    %31 = vector.load %arg7[%c20, %c0_25] : memref<36x128xbf16, #tpu.memory_space<vmem>>, vector<4x16xbf16>
    tpu.vector_store %arg7[%c20, %c0_25], %30 {strides = array<i32>} : memref<36x128xbf16, #tpu.memory_space<vmem>>, vector<4x16xbf16>,
    %c0_i32_26 = arith.constant 0 : i32
    %32 = arith.addi %3, %c0_i32_26 : i32
    %c2_i32 = arith.constant 2 : i32
    %33 = arith.addi %32, %c2_i32 : i32
    %c0_27 = arith.constant 0 : index
    %34 = arith.index_cast %33 : i32 to index
    %c0_28 = arith.constant 0 : index
    %c0_29 = arith.constant 0 : index
    %35 = vector.load %arg2[%c0_27, %34, %c0_28, %c0_29] : memref<1x18x4x18xbf16, #tpu.memory_space<vmem>>, vector<1x1x4x16xbf16>
    %36 = vector.shape_cast %35 : vector<1x1x4x16xbf16> to vector<4x16xbf16>
    %c24 = arith.constant 24 : index
    %c0_30 = arith.constant 0 : index
    %37 = vector.load %arg7[%c24, %c0_30] : memref<36x128xbf16, #tpu.memory_space<vmem>>, vector<4x16xbf16>
    tpu.vector_store %arg7[%c24, %c0_30], %36 {strides = array<i32>} : memref<36x128xbf16, #tpu.memory_space<vmem>>, vector<4x16xbf16>,
    %c0_31 = arith.constant 0 : index
    %38 = arith.index_cast %33 : i32 to index
    %c0_32 = arith.constant 0 : index
    %c1_33 = arith.constant 1 : index
    %39 = vector.load %arg2[%c0_31, %38, %c0_32, %c1_33] : memref<1x18x4x18xbf16, #tpu.memory_space<vmem>>, vector<1x1x4x16xbf16>
    %40 = vector.shape_cast %39 : vector<1x1x4x16xbf16> to vector<4x16xbf16>
    %c28 = arith.constant 28 : index
    %c0_34 = arith.constant 0 : index
    %41 = vector.load %arg7[%c28, %c0_34] : memref<36x128xbf16, #tpu.memory_space<vmem>>, vector<4x16xbf16>
    tpu.vector_store %arg7[%c28, %c0_34], %40 {strides = array<i32>} : memref<36x128xbf16, #tpu.memory_space<vmem>>, vector<4x16xbf16>,
    %c0_35 = arith.constant 0 : index
    %42 = arith.index_cast %33 : i32 to index
    %c0_36 = arith.constant 0 : index
    %c2_37 = arith.constant 2 : index
    %43 = vector.load %arg2[%c0_35, %42, %c0_36, %c2_37] : memref<1x18x4x18xbf16, #tpu.memory_space<vmem>>, vector<1x1x4x16xbf16>
    %44 = vector.shape_cast %43 : vector<1x1x4x16xbf16> to vector<4x16xbf16>
    %c32 = arith.constant 32 : index
    %c0_38 = arith.constant 0 : index
    %45 = vector.load %arg7[%c32, %c0_38] : memref<36x128xbf16, #tpu.memory_space<vmem>>, vector<4x16xbf16>
    tpu.vector_store %arg7[%c32, %c0_38], %44 {strides = array<i32>} : memref<36x128xbf16, #tpu.memory_space<vmem>>, vector<4x16xbf16>,
    %c1_i32_39 = arith.constant 1 : i32
    %46 = arith.addi %3, %c1_i32_39 : i32
    %c0_i32_40 = arith.constant 0 : i32
    %47 = arith.addi %46, %c0_i32_40 : i32
    %c0_41 = arith.constant 0 : index
    %48 = arith.index_cast %47 : i32 to index
    %c0_42 = arith.constant 0 : index
    %c0_43 = arith.constant 0 : index
    %49 = vector.load %arg2[%c0_41, %48, %c0_42, %c0_43] : memref<1x18x4x18xbf16, #tpu.memory_space<vmem>>, vector<1x1x4x16xbf16>
    %50 = vector.shape_cast %49 : vector<1x1x4x16xbf16> to vector<4x16xbf16>
    %c0_44 = arith.constant 0 : index
    %c16_45 = arith.constant 16 : index
    %51 = vector.load %arg7[%c0_44, %c16_45] : memref<36x128xbf16, #tpu.memory_space<vmem>>, vector<4x16xbf16>
    tpu.vector_store %arg7[%c0_44, %c16_45], %50 {strides = array<i32>} : memref<36x128xbf16, #tpu.memory_space<vmem>>, vector<4x16xbf16>,
    %c0_46 = arith.constant 0 : index
    %52 = arith.index_cast %47 : i32 to index
    %c0_47 = arith.constant 0 : index
    %c1_48 = arith.constant 1 : index
    %53 = vector.load %arg2[%c0_46, %52, %c0_47, %c1_48] : memref<1x18x4x18xbf16, #tpu.memory_space<vmem>>, vector<1x1x4x16xbf16>
    %54 = vector.shape_cast %53 : vector<1x1x4x16xbf16> to vector<4x16xbf16>
    %c4_49 = arith.constant 4 : index
    %c16_50 = arith.constant 16 : index
    %55 = vector.load %arg7[%c4_49, %c16_50] : memref<36x128xbf16, #tpu.memory_space<vmem>>, vector<4x16xbf16>
    tpu.vector_store %arg7[%c4_49, %c16_50], %54 {strides = array<i32>} : memref<36x128xbf16, #tpu.memory_space<vmem>>, vector<4x16xbf16>,
    %c0_51 = arith.constant 0 : index
    %56 = arith.index_cast %47 : i32 to index
    %c0_52 = arith.constant 0 : index
    %c2_53 = arith.constant 2 : index
    %57 = vector.load %arg2[%c0_51, %56, %c0_52, %c2_53] : memref<1x18x4x18xbf16, #tpu.memory_space<vmem>>, vector<1x1x4x16xbf16>
    %58 = vector.shape_cast %57 : vector<1x1x4x16xbf16> to vector<4x16xbf16>
    %c8_54 = arith.constant 8 : index
    %c16_55 = arith.constant 16 : index
    %59 = vector.load %arg7[%c8_54, %c16_55] : memref<36x128xbf16, #tpu.memory_space<vmem>>, vector<4x16xbf16>
    tpu.vector_store %arg7[%c8_54, %c16_55], %58 {strides = array<i32>} : memref<36x128xbf16, #tpu.memory_space<vmem>>, vector<4x16xbf16>,
    %c1_i32_56 = arith.constant 1 : i32
    %60 = arith.addi %3, %c1_i32_56 : i32
    %c1_i32_57 = arith.constant 1 : i32
    %61 = arith.addi %60, %c1_i32_57 : i32
    %c0_58 = arith.constant 0 : index
    %62 = arith.index_cast %61 : i32 to index
    %c0_59 = arith.constant 0 : index
    %c0_60 = arith.constant 0 : index
    %63 = vector.load %arg2[%c0_58, %62, %c0_59, %c0_60] : memref<1x18x4x18xbf16, #tpu.memory_space<vmem>>, vector<1x1x4x16xbf16>
    %64 = vector.shape_cast %63 : vector<1x1x4x16xbf16> to vector<4x16xbf16>
    %c12_61 = arith.constant 12 : index
    %c16_62 = arith.constant 16 : index
    %65 = vector.load %arg7[%c12_61, %c16_62] : memref<36x128xbf16, #tpu.memory_space<vmem>>, vector<4x16xbf16>
    tpu.vector_store %arg7[%c12_61, %c16_62], %64 {strides = array<i32>} : memref<36x128xbf16, #tpu.memory_space<vmem>>, vector<4x16xbf16>,
    %c0_63 = arith.constant 0 : index
    %66 = arith.index_cast %61 : i32 to index
    %c0_64 = arith.constant 0 : index
    %c1_65 = arith.constant 1 : index
    %67 = vector.load %arg2[%c0_63, %66, %c0_64, %c1_65] : memref<1x18x4x18xbf16, #tpu.memory_space<vmem>>, vector<1x1x4x16xbf16>
    %68 = vector.shape_cast %67 : vector<1x1x4x16xbf16> to vector<4x16xbf16>
    %c16_66 = arith.constant 16 : index
    %c16_67 = arith.constant 16 : index
    %69 = vector.load %arg7[%c16_66, %c16_67] : memref<36x128xbf16, #tpu.memory_space<vmem>>, vector<4x16xbf16>
    tpu.vector_store %arg7[%c16_66, %c16_67], %68 {strides = array<i32>} : memref<36x128xbf16, #tpu.memory_space<vmem>>, vector<4x16xbf16>,
    %c0_68 = arith.constant 0 : index
    %70 = arith.index_cast %61 : i32 to index
    %c0_69 = arith.constant 0 : index
    %c2_70 = arith.constant 2 : index
    %71 = vector.load %arg2[%c0_68, %70, %c0_69, %c2_70] : memref<1x18x4x18xbf16, #tpu.memory_space<vmem>>, vector<1x1x4x16xbf16>
    %72 = vector.shape_cast %71 : vector<1x1x4x16xbf16> to vector<4x16xbf16>
    %c20_71 = arith.constant 20 : index
    %c16_72 = arith.constant 16 : index
    %73 = vector.load %arg7[%c20_71, %c16_72] : memref<36x128xbf16, #tpu.memory_space<vmem>>, vector<4x16xbf16>
    tpu.vector_store %arg7[%c20_71, %c16_72], %72 {strides = array<i32>} : memref<36x128xbf16, #tpu.memory_space<vmem>>, vector<4x16xbf16>,
    %c1_i32_73 = arith.constant 1 : i32
    %74 = arith.addi %3, %c1_i32_73 : i32
    %c2_i32_74 = arith.constant 2 : i32
    %75 = arith.addi %74, %c2_i32_74 : i32
    %c0_75 = arith.constant 0 : index
    %76 = arith.index_cast %75 : i32 to index
    %c0_76 = arith.constant 0 : index
    %c0_77 = arith.constant 0 : index
    %77 = vector.load %arg2[%c0_75, %76, %c0_76, %c0_77] : memref<1x18x4x18xbf16, #tpu.memory_space<vmem>>, vector<1x1x4x16xbf16>
    %78 = vector.shape_cast %77 : vector<1x1x4x16xbf16> to vector<4x16xbf16>
    %c24_78 = arith.constant 24 : index
    %c16_79 = arith.constant 16 : index
    %79 = vector.load %arg7[%c24_78, %c16_79] : memref<36x128xbf16, #tpu.memory_space<vmem>>, vector<4x16xbf16>
    tpu.vector_store %arg7[%c24_78, %c16_79], %78 {strides = array<i32>} : memref<36x128xbf16, #tpu.memory_space<vmem>>, vector<4x16xbf16>,
    %c0_80 = arith.constant 0 : index
    %80 = arith.index_cast %75 : i32 to index
    %c0_81 = arith.constant 0 : index
    %c1_82 = arith.constant 1 : index
    %81 = vector.load %arg2[%c0_80, %80, %c0_81, %c1_82] : memref<1x18x4x18xbf16, #tpu.memory_space<vmem>>, vector<1x1x4x16xbf16>
    %82 = vector.shape_cast %81 : vector<1x1x4x16xbf16> to vector<4x16xbf16>
    %c28_83 = arith.constant 28 : index
    %c16_84 = arith.constant 16 : index
    %83 = vector.load %arg7[%c28_83, %c16_84] : memref<36x128xbf16, #tpu.memory_space<vmem>>, vector<4x16xbf16>
    tpu.vector_store %arg7[%c28_83, %c16_84], %82 {strides = array<i32>} : memref<36x128xbf16, #tpu.memory_space<vmem>>, vector<4x16xbf16>,
    %c0_85 = arith.constant 0 : index
    %84 = arith.index_cast %75 : i32 to index
    %c0_86 = arith.constant 0 : index
    %c2_87 = arith.constant 2 : index
    %85 = vector.load %arg2[%c0_85, %84, %c0_86, %c2_87] : memref<1x18x4x18xbf16, #tpu.memory_space<vmem>>, vector<1x1x4x16xbf16>
    %86 = vector.shape_cast %85 : vector<1x1x4x16xbf16> to vector<4x16xbf16>
    %c32_88 = arith.constant 32 : index
    %c16_89 = arith.constant 16 : index
    %87 = vector.load %arg7[%c32_88, %c16_89] : memref<36x128xbf16, #tpu.memory_space<vmem>>, vector<4x16xbf16>
    tpu.vector_store %arg7[%c32_88, %c16_89], %86 {strides = array<i32>} : memref<36x128xbf16, #tpu.memory_space<vmem>>, vector<4x16xbf16>,
    %c2_i32_90 = arith.constant 2 : i32
    %88 = arith.addi %3, %c2_i32_90 : i32
    %c0_i32_91 = arith.constant 0 : i32
    %89 = arith.addi %88, %c0_i32_91 : i32
    %c0_92 = arith.constant 0 : index
    %90 = arith.index_cast %89 : i32 to index
    %c0_93 = arith.constant 0 : index
    %c0_94 = arith.constant 0 : index
    %91 = vector.load %arg2[%c0_92, %90, %c0_93, %c0_94] : memref<1x18x4x18xbf16, #tpu.memory_space<vmem>>, vector<1x1x4x16xbf16>
    %92 = vector.shape_cast %91 : vector<1x1x4x16xbf16> to vector<4x16xbf16>
    %c0_95 = arith.constant 0 : index
    %c32_96 = arith.constant 32 : index
    %93 = vector.load %arg7[%c0_95, %c32_96] : memref<36x128xbf16, #tpu.memory_space<vmem>>, vector<4x16xbf16>
    tpu.vector_store %arg7[%c0_95, %c32_96], %92 {strides = array<i32>} : memref<36x128xbf16, #tpu.memory_space<vmem>>, vector<4x16xbf16>,
    %c0_97 = arith.constant 0 : index
    %94 = arith.index_cast %89 : i32 to index
    %c0_98 = arith.constant 0 : index
    %c1_99 = arith.constant 1 : index
    %95 = vector.load %arg2[%c0_97, %94, %c0_98, %c1_99] : memref<1x18x4x18xbf16, #tpu.memory_space<vmem>>, vector<1x1x4x16xbf16>
    %96 = vector.shape_cast %95 : vector<1x1x4x16xbf16> to vector<4x16xbf16>
    %c4_100 = arith.constant 4 : index
    %c32_101 = arith.constant 32 : index
    %97 = vector.load %arg7[%c4_100, %c32_101] : memref<36x128xbf16, #tpu.memory_space<vmem>>, vector<4x16xbf16>
    tpu.vector_store %arg7[%c4_100, %c32_101], %96 {strides = array<i32>} : memref<36x128xbf16, #tpu.memory_space<vmem>>, vector<4x16xbf16>,
    %c0_102 = arith.constant 0 : index
    %98 = arith.index_cast %89 : i32 to index
    %c0_103 = arith.constant 0 : index
    %c2_104 = arith.constant 2 : index
    %99 = vector.load %arg2[%c0_102, %98, %c0_103, %c2_104] : memref<1x18x4x18xbf16, #tpu.memory_space<vmem>>, vector<1x1x4x16xbf16>
    %100 = vector.shape_cast %99 : vector<1x1x4x16xbf16> to vector<4x16xbf16>
    %c8_105 = arith.constant 8 : index
    %c32_106 = arith.constant 32 : index
    %101 = vector.load %arg7[%c8_105, %c32_106] : memref<36x128xbf16, #tpu.memory_space<vmem>>, vector<4x16xbf16>
    tpu.vector_store %arg7[%c8_105, %c32_106], %100 {strides = array<i32>} : memref<36x128xbf16, #tpu.memory_space<vmem>>, vector<4x16xbf16>,
    %c2_i32_107 = arith.constant 2 : i32
    %102 = arith.addi %3, %c2_i32_107 : i32
    %c1_i32_108 = arith.constant 1 : i32
    %103 = arith.addi %102, %c1_i32_108 : i32
    %c0_109 = arith.constant 0 : index
    %104 = arith.index_cast %103 : i32 to index
    %c0_110 = arith.constant 0 : index
    %c0_111 = arith.constant 0 : index
    %105 = vector.load %arg2[%c0_109, %104, %c0_110, %c0_111] : memref<1x18x4x18xbf16, #tpu.memory_space<vmem>>, vector<1x1x4x16xbf16>
    %106 = vector.shape_cast %105 : vector<1x1x4x16xbf16> to vector<4x16xbf16>
    %c12_112 = arith.constant 12 : index
    %c32_113 = arith.constant 32 : index
    %107 = vector.load %arg7[%c12_112, %c32_113] : memref<36x128xbf16, #tpu.memory_space<vmem>>, vector<4x16xbf16>
    tpu.vector_store %arg7[%c12_112, %c32_113], %106 {strides = array<i32>} : memref<36x128xbf16, #tpu.memory_space<vmem>>, vector<4x16xbf16>,
    %c0_114 = arith.constant 0 : index
    %108 = arith.index_cast %103 : i32 to index
    %c0_115 = arith.constant 0 : index
    %c1_116 = arith.constant 1 : index
    %109 = vector.load %arg2[%c0_114, %108, %c0_115, %c1_116] : memref<1x18x4x18xbf16, #tpu.memory_space<vmem>>, vector<1x1x4x16xbf16>
    %110 = vector.shape_cast %109 : vector<1x1x4x16xbf16> to vector<4x16xbf16>
    %c16_117 = arith.constant 16 : index
    %c32_118 = arith.constant 32 : index
    %111 = vector.load %arg7[%c16_117, %c32_118] : memref<36x128xbf16, #tpu.memory_space<vmem>>, vector<4x16xbf16>
    tpu.vector_store %arg7[%c16_117, %c32_118], %110 {strides = array<i32>} : memref<36x128xbf16, #tpu.memory_space<vmem>>, vector<4x16xbf16>,
    %c0_119 = arith.constant 0 : index
    %112 = arith.index_cast %103 : i32 to index
    %c0_120 = arith.constant 0 : index
    %c2_121 = arith.constant 2 : index
    %113 = vector.load %arg2[%c0_119, %112, %c0_120, %c2_121] : memref<1x18x4x18xbf16, #tpu.memory_space<vmem>>, vector<1x1x4x16xbf16>
    %114 = vector.shape_cast %113 : vector<1x1x4x16xbf16> to vector<4x16xbf16>
    %c20_122 = arith.constant 20 : index
    %c32_123 = arith.constant 32 : index
    %115 = vector.load %arg7[%c20_122, %c32_123] : memref<36x128xbf16, #tpu.memory_space<vmem>>, vector<4x16xbf16>
    tpu.vector_store %arg7[%c20_122, %c32_123], %114 {strides = array<i32>} : memref<36x128xbf16, #tpu.memory_space<vmem>>, vector<4x16xbf16>,
    %c2_i32_124 = arith.constant 2 : i32
    %116 = arith.addi %3, %c2_i32_124 : i32
    %c2_i32_125 = arith.constant 2 : i32
    %117 = arith.addi %116, %c2_i32_125 : i32
    %c0_126 = arith.constant 0 : index
    %118 = arith.index_cast %117 : i32 to index
    %c0_127 = arith.constant 0 : index
    %c0_128 = arith.constant 0 : index
    %119 = vector.load %arg2[%c0_126, %118, %c0_127, %c0_128] : memref<1x18x4x18xbf16, #tpu.memory_space<vmem>>, vector<1x1x4x16xbf16>
    %120 = vector.shape_cast %119 : vector<1x1x4x16xbf16> to vector<4x16xbf16>
    %c24_129 = arith.constant 24 : index
    %c32_130 = arith.constant 32 : index
    %121 = vector.load %arg7[%c24_129, %c32_130] : memref<36x128xbf16, #tpu.memory_space<vmem>>, vector<4x16xbf16>
    tpu.vector_store %arg7[%c24_129, %c32_130], %120 {strides = array<i32>} : memref<36x128xbf16, #tpu.memory_space<vmem>>, vector<4x16xbf16>,
    %c0_131 = arith.constant 0 : index
    %122 = arith.index_cast %117 : i32 to index
    %c0_132 = arith.constant 0 : index
    %c1_133 = arith.constant 1 : index
    %123 = vector.load %arg2[%c0_131, %122, %c0_132, %c1_133] : memref<1x18x4x18xbf16, #tpu.memory_space<vmem>>, vector<1x1x4x16xbf16>
    %124 = vector.shape_cast %123 : vector<1x1x4x16xbf16> to vector<4x16xbf16>
    %c28_134 = arith.constant 28 : index
    %c32_135 = arith.constant 32 : index
    %125 = vector.load %arg7[%c28_134, %c32_135] : memref<36x128xbf16, #tpu.memory_space<vmem>>, vector<4x16xbf16>
    tpu.vector_store %arg7[%c28_134, %c32_135], %124 {strides = array<i32>} : memref<36x128xbf16, #tpu.memory_space<vmem>>, vector<4x16xbf16>,
    %c0_136 = arith.constant 0 : index
    %126 = arith.index_cast %117 : i32 to index
    %c0_137 = arith.constant 0 : index
    %c2_138 = arith.constant 2 : index
    %127 = vector.load %arg2[%c0_136, %126, %c0_137, %c2_138] : memref<1x18x4x18xbf16, #tpu.memory_space<vmem>>, vector<1x1x4x16xbf16>
    %128 = vector.shape_cast %127 : vector<1x1x4x16xbf16> to vector<4x16xbf16>
    %c32_139 = arith.constant 32 : index
    %c32_140 = arith.constant 32 : index
    %129 = vector.load %arg7[%c32_139, %c32_140] : memref<36x128xbf16, #tpu.memory_space<vmem>>, vector<4x16xbf16>
    tpu.vector_store %arg7[%c32_139, %c32_140], %128 {strides = array<i32>} : memref<36x128xbf16, #tpu.memory_space<vmem>>, vector<4x16xbf16>,
    %c3_i32 = arith.constant 3 : i32
    %130 = arith.addi %3, %c3_i32 : i32
    %c0_i32_141 = arith.constant 0 : i32
    %131 = arith.addi %130, %c0_i32_141 : i32
    %c0_142 = arith.constant 0 : index
    %132 = arith.index_cast %131 : i32 to index
    %c0_143 = arith.constant 0 : index
    %c0_144 = arith.constant 0 : index
    %133 = vector.load %arg2[%c0_142, %132, %c0_143, %c0_144] : memref<1x18x4x18xbf16, #tpu.memory_space<vmem>>, vector<1x1x4x16xbf16>
    %134 = vector.shape_cast %133 : vector<1x1x4x16xbf16> to vector<4x16xbf16>
    %c0_145 = arith.constant 0 : index
    %c48 = arith.constant 48 : index
    %135 = vector.load %arg7[%c0_145, %c48] : memref<36x128xbf16, #tpu.memory_space<vmem>>, vector<4x16xbf16>
    tpu.vector_store %arg7[%c0_145, %c48], %134 {strides = array<i32>} : memref<36x128xbf16, #tpu.memory_space<vmem>>, vector<4x16xbf16>,
    %c0_146 = arith.constant 0 : index
    %136 = arith.index_cast %131 : i32 to index
    %c0_147 = arith.constant 0 : index
    %c1_148 = arith.constant 1 : index
    %137 = vector.load %arg2[%c0_146, %136, %c0_147, %c1_148] : memref<1x18x4x18xbf16, #tpu.memory_space<vmem>>, vector<1x1x4x16xbf16>
    %138 = vector.shape_cast %137 : vector<1x1x4x16xbf16> to vector<4x16xbf16>
    %c4_149 = arith.constant 4 : index
    %c48_150 = arith.constant 48 : index
    %139 = vector.load %arg7[%c4_149, %c48_150] : memref<36x128xbf16, #tpu.memory_space<vmem>>, vector<4x16xbf16>
    tpu.vector_store %arg7[%c4_149, %c48_150], %138 {strides = array<i32>} : memref<36x128xbf16, #tpu.memory_space<vmem>>, vector<4x16xbf16>,
    %c0_151 = arith.constant 0 : index
    %140 = arith.index_cast %131 : i32 to index
    %c0_152 = arith.constant 0 : index
    %c2_153 = arith.constant 2 : index
    %141 = vector.load %arg2[%c0_151, %140, %c0_152, %c2_153] : memref<1x18x4x18xbf16, #tpu.memory_space<vmem>>, vector<1x1x4x16xbf16>
    %142 = vector.shape_cast %141 : vector<1x1x4x16xbf16> to vector<4x16xbf16>
    %c8_154 = arith.constant 8 : index
    %c48_155 = arith.constant 48 : index
    %143 = vector.load %arg7[%c8_154, %c48_155] : memref<36x128xbf16, #tpu.memory_space<vmem>>, vector<4x16xbf16>
    tpu.vector_store %arg7[%c8_154, %c48_155], %142 {strides = array<i32>} : memref<36x128xbf16, #tpu.memory_space<vmem>>, vector<4x16xbf16>,
    %c3_i32_156 = arith.constant 3 : i32
    %144 = arith.addi %3, %c3_i32_156 : i32
    %c1_i32_157 = arith.constant 1 : i32
    %145 = arith.addi %144, %c1_i32_157 : i32
    %c0_158 = arith.constant 0 : index
    %146 = arith.index_cast %145 : i32 to index
    %c0_159 = arith.constant 0 : index
    %c0_160 = arith.constant 0 : index
    %147 = vector.load %arg2[%c0_158, %146, %c0_159, %c0_160] : memref<1x18x4x18xbf16, #tpu.memory_space<vmem>>, vector<1x1x4x16xbf16>
    %148 = vector.shape_cast %147 : vector<1x1x4x16xbf16> to vector<4x16xbf16>
    %c12_161 = arith.constant 12 : index
    %c48_162 = arith.constant 48 : index
    %149 = vector.load %arg7[%c12_161, %c48_162] : memref<36x128xbf16, #tpu.memory_space<vmem>>, vector<4x16xbf16>
    tpu.vector_store %arg7[%c12_161, %c48_162], %148 {strides = array<i32>} : memref<36x128xbf16, #tpu.memory_space<vmem>>, vector<4x16xbf16>,
    %c0_163 = arith.constant 0 : index
    %150 = arith.index_cast %145 : i32 to index
    %c0_164 = arith.constant 0 : index
    %c1_165 = arith.constant 1 : index
    %151 = vector.load %arg2[%c0_163, %150, %c0_164, %c1_165] : memref<1x18x4x18xbf16, #tpu.memory_space<vmem>>, vector<1x1x4x16xbf16>
    %152 = vector.shape_cast %151 : vector<1x1x4x16xbf16> to vector<4x16xbf16>
    %c16_166 = arith.constant 16 : index
    %c48_167 = arith.constant 48 : index
    %153 = vector.load %arg7[%c16_166, %c48_167] : memref<36x128xbf16, #tpu.memory_space<vmem>>, vector<4x16xbf16>
    tpu.vector_store %arg7[%c16_166, %c48_167], %152 {strides = array<i32>} : memref<36x128xbf16, #tpu.memory_space<vmem>>, vector<4x16xbf16>,
    %c0_168 = arith.constant 0 : index
    %154 = arith.index_cast %145 : i32 to index
    %c0_169 = arith.constant 0 : index
    %c2_170 = arith.constant 2 : index
    %155 = vector.load %arg2[%c0_168, %154, %c0_169, %c2_170] : memref<1x18x4x18xbf16, #tpu.memory_space<vmem>>, vector<1x1x4x16xbf16>
    %156 = vector.shape_cast %155 : vector<1x1x4x16xbf16> to vector<4x16xbf16>
    %c20_171 = arith.constant 20 : index
    %c48_172 = arith.constant 48 : index
    %157 = vector.load %arg7[%c20_171, %c48_172] : memref<36x128xbf16, #tpu.memory_space<vmem>>, vector<4x16xbf16>
    tpu.vector_store %arg7[%c20_171, %c48_172], %156 {strides = array<i32>} : memref<36x128xbf16, #tpu.memory_space<vmem>>, vector<4x16xbf16>,
    %c3_i32_173 = arith.constant 3 : i32
    %158 = arith.addi %3, %c3_i32_173 : i32
    %c2_i32_174 = arith.constant 2 : i32
    %159 = arith.addi %158, %c2_i32_174 : i32
    %c0_175 = arith.constant 0 : index
    %160 = arith.index_cast %159 : i32 to index
    %c0_176 = arith.constant 0 : index
    %c0_177 = arith.constant 0 : index
    %161 = vector.load %arg2[%c0_175, %160, %c0_176, %c0_177] : memref<1x18x4x18xbf16, #tpu.memory_space<vmem>>, vector<1x1x4x16xbf16>
    %162 = vector.shape_cast %161 : vector<1x1x4x16xbf16> to vector<4x16xbf16>
    %c24_178 = arith.constant 24 : index
    %c48_179 = arith.constant 48 : index
    %163 = vector.load %arg7[%c24_178, %c48_179] : memref<36x128xbf16, #tpu.memory_space<vmem>>, vector<4x16xbf16>
    tpu.vector_store %arg7[%c24_178, %c48_179], %162 {strides = array<i32>} : memref<36x128xbf16, #tpu.memory_space<vmem>>, vector<4x16xbf16>,
    %c0_180 = arith.constant 0 : index
    %164 = arith.index_cast %159 : i32 to index
    %c0_181 = arith.constant 0 : index
    %c1_182 = arith.constant 1 : index
    %165 = vector.load %arg2[%c0_180, %164, %c0_181, %c1_182] : memref<1x18x4x18xbf16, #tpu.memory_space<vmem>>, vector<1x1x4x16xbf16>
    %166 = vector.shape_cast %165 : vector<1x1x4x16xbf16> to vector<4x16xbf16>
    %c28_183 = arith.constant 28 : index
    %c48_184 = arith.constant 48 : index
    %167 = vector.load %arg7[%c28_183, %c48_184] : memref<36x128xbf16, #tpu.memory_space<vmem>>, vector<4x16xbf16>
    tpu.vector_store %arg7[%c28_183, %c48_184], %166 {strides = array<i32>} : memref<36x128xbf16, #tpu.memory_space<vmem>>, vector<4x16xbf16>,
    %c0_185 = arith.constant 0 : index
    %168 = arith.index_cast %159 : i32 to index
    %c0_186 = arith.constant 0 : index
    %c2_187 = arith.constant 2 : index
    %169 = vector.load %arg2[%c0_185, %168, %c0_186, %c2_187] : memref<1x18x4x18xbf16, #tpu.memory_space<vmem>>, vector<1x1x4x16xbf16>
    %170 = vector.shape_cast %169 : vector<1x1x4x16xbf16> to vector<4x16xbf16>
    %c32_188 = arith.constant 32 : index
    %c48_189 = arith.constant 48 : index
    %171 = vector.load %arg7[%c32_188, %c48_189] : memref<36x128xbf16, #tpu.memory_space<vmem>>, vector<4x16xbf16>
    tpu.vector_store %arg7[%c32_188, %c48_189], %170 {strides = array<i32>} : memref<36x128xbf16, #tpu.memory_space<vmem>>, vector<4x16xbf16>,
    %c4_i32 = arith.constant 4 : i32
    %172 = arith.addi %3, %c4_i32 : i32
    %c0_i32_190 = arith.constant 0 : i32
    %173 = arith.addi %172, %c0_i32_190 : i32
    %c0_191 = arith.constant 0 : index
    %174 = arith.index_cast %173 : i32 to index
    %c0_192 = arith.constant 0 : index
    %c0_193 = arith.constant 0 : index
    %175 = vector.load %arg2[%c0_191, %174, %c0_192, %c0_193] : memref<1x18x4x18xbf16, #tpu.memory_space<vmem>>, vector<1x1x4x16xbf16>
    %176 = vector.shape_cast %175 : vector<1x1x4x16xbf16> to vector<4x16xbf16>
    %c0_194 = arith.constant 0 : index
    %c64 = arith.constant 64 : index
    %177 = vector.load %arg7[%c0_194, %c64] : memref<36x128xbf16, #tpu.memory_space<vmem>>, vector<4x16xbf16>
    tpu.vector_store %arg7[%c0_194, %c64], %176 {strides = array<i32>} : memref<36x128xbf16, #tpu.memory_space<vmem>>, vector<4x16xbf16>,
    %c0_195 = arith.constant 0 : index
    %178 = arith.index_cast %173 : i32 to index
    %c0_196 = arith.constant 0 : index
    %c1_197 = arith.constant 1 : index
    %179 = vector.load %arg2[%c0_195, %178, %c0_196, %c1_197] : memref<1x18x4x18xbf16, #tpu.memory_space<vmem>>, vector<1x1x4x16xbf16>
    %180 = vector.shape_cast %179 : vector<1x1x4x16xbf16> to vector<4x16xbf16>
    %c4_198 = arith.constant 4 : index
    %c64_199 = arith.constant 64 : index
    %181 = vector.load %arg7[%c4_198, %c64_199] : memref<36x128xbf16, #tpu.memory_space<vmem>>, vector<4x16xbf16>
    tpu.vector_store %arg7[%c4_198, %c64_199], %180 {strides = array<i32>} : memref<36x128xbf16, #tpu.memory_space<vmem>>, vector<4x16xbf16>,
    %c0_200 = arith.constant 0 : index
    %182 = arith.index_cast %173 : i32 to index
    %c0_201 = arith.constant 0 : index
    %c2_202 = arith.constant 2 : index
    %183 = vector.load %arg2[%c0_200, %182, %c0_201, %c2_202] : memref<1x18x4x18xbf16, #tpu.memory_space<vmem>>, vector<1x1x4x16xbf16>
    %184 = vector.shape_cast %183 : vector<1x1x4x16xbf16> to vector<4x16xbf16>
    %c8_203 = arith.constant 8 : index
    %c64_204 = arith.constant 64 : index
    %185 = vector.load %arg7[%c8_203, %c64_204] : memref<36x128xbf16, #tpu.memory_space<vmem>>, vector<4x16xbf16>
    tpu.vector_store %arg7[%c8_203, %c64_204], %184 {strides = array<i32>} : memref<36x128xbf16, #tpu.memory_space<vmem>>, vector<4x16xbf16>,
    %c4_i32_205 = arith.constant 4 : i32
    %186 = arith.addi %3, %c4_i32_205 : i32
    %c1_i32_206 = arith.constant 1 : i32
    %187 = arith.addi %186, %c1_i32_206 : i32
    %c0_207 = arith.constant 0 : index
    %188 = arith.index_cast %187 : i32 to index
    %c0_208 = arith.constant 0 : index
    %c0_209 = arith.constant 0 : index
    %189 = vector.load %arg2[%c0_207, %188, %c0_208, %c0_209] : memref<1x18x4x18xbf16, #tpu.memory_space<vmem>>, vector<1x1x4x16xbf16>
    %190 = vector.shape_cast %189 : vector<1x1x4x16xbf16> to vector<4x16xbf16>
    %c12_210 = arith.constant 12 : index
    %c64_211 = arith.constant 64 : index
    %191 = vector.load %arg7[%c12_210, %c64_211] : memref<36x128xbf16, #tpu.memory_space<vmem>>, vector<4x16xbf16>
    tpu.vector_store %arg7[%c12_210, %c64_211], %190 {strides = array<i32>} : memref<36x128xbf16, #tpu.memory_space<vmem>>, vector<4x16xbf16>,
    %c0_212 = arith.constant 0 : index
    %192 = arith.index_cast %187 : i32 to index
    %c0_213 = arith.constant 0 : index
    %c1_214 = arith.constant 1 : index
    %193 = vector.load %arg2[%c0_212, %192, %c0_213, %c1_214] : memref<1x18x4x18xbf16, #tpu.memory_space<vmem>>, vector<1x1x4x16xbf16>
    %194 = vector.shape_cast %193 : vector<1x1x4x16xbf16> to vector<4x16xbf16>
    %c16_215 = arith.constant 16 : index
    %c64_216 = arith.constant 64 : index
    %195 = vector.load %arg7[%c16_215, %c64_216] : memref<36x128xbf16, #tpu.memory_space<vmem>>, vector<4x16xbf16>
    tpu.vector_store %arg7[%c16_215, %c64_216], %194 {strides = array<i32>} : memref<36x128xbf16, #tpu.memory_space<vmem>>, vector<4x16xbf16>,
    %c0_217 = arith.constant 0 : index
    %196 = arith.index_cast %187 : i32 to index
    %c0_218 = arith.constant 0 : index
    %c2_219 = arith.constant 2 : index
    %197 = vector.load %arg2[%c0_217, %196, %c0_218, %c2_219] : memref<1x18x4x18xbf16, #tpu.memory_space<vmem>>, vector<1x1x4x16xbf16>
    %198 = vector.shape_cast %197 : vector<1x1x4x16xbf16> to vector<4x16xbf16>
    %c20_220 = arith.constant 20 : index
    %c64_221 = arith.constant 64 : index
    %199 = vector.load %arg7[%c20_220, %c64_221] : memref<36x128xbf16, #tpu.memory_space<vmem>>, vector<4x16xbf16>
    tpu.vector_store %arg7[%c20_220, %c64_221], %198 {strides = array<i32>} : memref<36x128xbf16, #tpu.memory_space<vmem>>, vector<4x16xbf16>,
    %c4_i32_222 = arith.constant 4 : i32
    %200 = arith.addi %3, %c4_i32_222 : i32
    %c2_i32_223 = arith.constant 2 : i32
    %201 = arith.addi %200, %c2_i32_223 : i32
    %c0_224 = arith.constant 0 : index
    %202 = arith.index_cast %201 : i32 to index
    %c0_225 = arith.constant 0 : index
    %c0_226 = arith.constant 0 : index
    %203 = vector.load %arg2[%c0_224, %202, %c0_225, %c0_226] : memref<1x18x4x18xbf16, #tpu.memory_space<vmem>>, vector<1x1x4x16xbf16>
    %204 = vector.shape_cast %203 : vector<1x1x4x16xbf16> to vector<4x16xbf16>
    %c24_227 = arith.constant 24 : index
    %c64_228 = arith.constant 64 : index
    %205 = vector.load %arg7[%c24_227, %c64_228] : memref<36x128xbf16, #tpu.memory_space<vmem>>, vector<4x16xbf16>
    tpu.vector_store %arg7[%c24_227, %c64_228], %204 {strides = array<i32>} : memref<36x128xbf16, #tpu.memory_space<vmem>>, vector<4x16xbf16>,
    %c0_229 = arith.constant 0 : index
    %206 = arith.index_cast %201 : i32 to index
    %c0_230 = arith.constant 0 : index
    %c1_231 = arith.constant 1 : index
    %207 = vector.load %arg2[%c0_229, %206, %c0_230, %c1_231] : memref<1x18x4x18xbf16, #tpu.memory_space<vmem>>, vector<1x1x4x16xbf16>
    %208 = vector.shape_cast %207 : vector<1x1x4x16xbf16> to vector<4x16xbf16>
    %c28_232 = arith.constant 28 : index
    %c64_233 = arith.constant 64 : index
    %209 = vector.load %arg7[%c28_232, %c64_233] : memref<36x128xbf16, #tpu.memory_space<vmem>>, vector<4x16xbf16>
    tpu.vector_store %arg7[%c28_232, %c64_233], %208 {strides = array<i32>} : memref<36x128xbf16, #tpu.memory_space<vmem>>, vector<4x16xbf16>,
    %c0_234 = arith.constant 0 : index
    %210 = arith.index_cast %201 : i32 to index
    %c0_235 = arith.constant 0 : index
    %c2_236 = arith.constant 2 : index
    %211 = vector.load %arg2[%c0_234, %210, %c0_235, %c2_236] : memref<1x18x4x18xbf16, #tpu.memory_space<vmem>>, vector<1x1x4x16xbf16>
    %212 = vector.shape_cast %211 : vector<1x1x4x16xbf16> to vector<4x16xbf16>
    %c32_237 = arith.constant 32 : index
    %c64_238 = arith.constant 64 : index
    %213 = vector.load %arg7[%c32_237, %c64_238] : memref<36x128xbf16, #tpu.memory_space<vmem>>, vector<4x16xbf16>
    tpu.vector_store %arg7[%c32_237, %c64_238], %212 {strides = array<i32>} : memref<36x128xbf16, #tpu.memory_space<vmem>>, vector<4x16xbf16>,
    %c5_i32 = arith.constant 5 : i32
    %214 = arith.addi %3, %c5_i32 : i32
    %c0_i32_239 = arith.constant 0 : i32
    %215 = arith.addi %214, %c0_i32_239 : i32
    %c0_240 = arith.constant 0 : index
    %216 = arith.index_cast %215 : i32 to index
    %c0_241 = arith.constant 0 : index
    %c0_242 = arith.constant 0 : index
    %217 = vector.load %arg2[%c0_240, %216, %c0_241, %c0_242] : memref<1x18x4x18xbf16, #tpu.memory_space<vmem>>, vector<1x1x4x16xbf16>
    %218 = vector.shape_cast %217 : vector<1x1x4x16xbf16> to vector<4x16xbf16>
    %c0_243 = arith.constant 0 : index
    %c80 = arith.constant 80 : index
    %219 = vector.load %arg7[%c0_243, %c80] : memref<36x128xbf16, #tpu.memory_space<vmem>>, vector<4x16xbf16>
    tpu.vector_store %arg7[%c0_243, %c80], %218 {strides = array<i32>} : memref<36x128xbf16, #tpu.memory_space<vmem>>, vector<4x16xbf16>,
    %c0_244 = arith.constant 0 : index
    %220 = arith.index_cast %215 : i32 to index
    %c0_245 = arith.constant 0 : index
    %c1_246 = arith.constant 1 : index
    %221 = vector.load %arg2[%c0_244, %220, %c0_245, %c1_246] : memref<1x18x4x18xbf16, #tpu.memory_space<vmem>>, vector<1x1x4x16xbf16>
    %222 = vector.shape_cast %221 : vector<1x1x4x16xbf16> to vector<4x16xbf16>
    %c4_247 = arith.constant 4 : index
    %c80_248 = arith.constant 80 : index
    %223 = vector.load %arg7[%c4_247, %c80_248] : memref<36x128xbf16, #tpu.memory_space<vmem>>, vector<4x16xbf16>
    tpu.vector_store %arg7[%c4_247, %c80_248], %222 {strides = array<i32>} : memref<36x128xbf16, #tpu.memory_space<vmem>>, vector<4x16xbf16>,
    %c0_249 = arith.constant 0 : index
    %224 = arith.index_cast %215 : i32 to index
    %c0_250 = arith.constant 0 : index
    %c2_251 = arith.constant 2 : index
    %225 = vector.load %arg2[%c0_249, %224, %c0_250, %c2_251] : memref<1x18x4x18xbf16, #tpu.memory_space<vmem>>, vector<1x1x4x16xbf16>
    %226 = vector.shape_cast %225 : vector<1x1x4x16xbf16> to vector<4x16xbf16>
    %c8_252 = arith.constant 8 : index
    %c80_253 = arith.constant 80 : index
    %227 = vector.load %arg7[%c8_252, %c80_253] : memref<36x128xbf16, #tpu.memory_space<vmem>>, vector<4x16xbf16>
    tpu.vector_store %arg7[%c8_252, %c80_253], %226 {strides = array<i32>} : memref<36x128xbf16, #tpu.memory_space<vmem>>, vector<4x16xbf16>,
    %c5_i32_254 = arith.constant 5 : i32
    %228 = arith.addi %3, %c5_i32_254 : i32
    %c1_i32_255 = arith.constant 1 : i32
    %229 = arith.addi %228, %c1_i32_255 : i32
    %c0_256 = arith.constant 0 : index
    %230 = arith.index_cast %229 : i32 to index
    %c0_257 = arith.constant 0 : index
    %c0_258 = arith.constant 0 : index
    %231 = vector.load %arg2[%c0_256, %230, %c0_257, %c0_258] : memref<1x18x4x18xbf16, #tpu.memory_space<vmem>>, vector<1x1x4x16xbf16>
    %232 = vector.shape_cast %231 : vector<1x1x4x16xbf16> to vector<4x16xbf16>
    %c12_259 = arith.constant 12 : index
    %c80_260 = arith.constant 80 : index
    %233 = vector.load %arg7[%c12_259, %c80_260] : memref<36x128xbf16, #tpu.memory_space<vmem>>, vector<4x16xbf16>
    tpu.vector_store %arg7[%c12_259, %c80_260], %232 {strides = array<i32>} : memref<36x128xbf16, #tpu.memory_space<vmem>>, vector<4x16xbf16>,
    %c0_261 = arith.constant 0 : index
    %234 = arith.index_cast %229 : i32 to index
    %c0_262 = arith.constant 0 : index
    %c1_263 = arith.constant 1 : index
    %235 = vector.load %arg2[%c0_261, %234, %c0_262, %c1_263] : memref<1x18x4x18xbf16, #tpu.memory_space<vmem>>, vector<1x1x4x16xbf16>
    %236 = vector.shape_cast %235 : vector<1x1x4x16xbf16> to vector<4x16xbf16>
    %c16_264 = arith.constant 16 : index
    %c80_265 = arith.constant 80 : index
    %237 = vector.load %arg7[%c16_264, %c80_265] : memref<36x128xbf16, #tpu.memory_space<vmem>>, vector<4x16xbf16>
    tpu.vector_store %arg7[%c16_264, %c80_265], %236 {strides = array<i32>} : memref<36x128xbf16, #tpu.memory_space<vmem>>, vector<4x16xbf16>,
    %c0_266 = arith.constant 0 : index
    %238 = arith.index_cast %229 : i32 to index
    %c0_267 = arith.constant 0 : index
    %c2_268 = arith.constant 2 : index
    %239 = vector.load %arg2[%c0_266, %238, %c0_267, %c2_268] : memref<1x18x4x18xbf16, #tpu.memory_space<vmem>>, vector<1x1x4x16xbf16>
    %240 = vector.shape_cast %239 : vector<1x1x4x16xbf16> to vector<4x16xbf16>
    %c20_269 = arith.constant 20 : index
    %c80_270 = arith.constant 80 : index
    %241 = vector.load %arg7[%c20_269, %c80_270] : memref<36x128xbf16, #tpu.memory_space<vmem>>, vector<4x16xbf16>
    tpu.vector_store %arg7[%c20_269, %c80_270], %240 {strides = array<i32>} : memref<36x128xbf16, #tpu.memory_space<vmem>>, vector<4x16xbf16>,
    %c5_i32_271 = arith.constant 5 : i32
    %242 = arith.addi %3, %c5_i32_271 : i32
    %c2_i32_272 = arith.constant 2 : i32
    %243 = arith.addi %242, %c2_i32_272 : i32
    %c0_273 = arith.constant 0 : index
    %244 = arith.index_cast %243 : i32 to index
    %c0_274 = arith.constant 0 : index
    %c0_275 = arith.constant 0 : index
    %245 = vector.load %arg2[%c0_273, %244, %c0_274, %c0_275] : memref<1x18x4x18xbf16, #tpu.memory_space<vmem>>, vector<1x1x4x16xbf16>
    %246 = vector.shape_cast %245 : vector<1x1x4x16xbf16> to vector<4x16xbf16>
    %c24_276 = arith.constant 24 : index
    %c80_277 = arith.constant 80 : index
    %247 = vector.load %arg7[%c24_276, %c80_277] : memref<36x128xbf16, #tpu.memory_space<vmem>>, vector<4x16xbf16>
    tpu.vector_store %arg7[%c24_276, %c80_277], %246 {strides = array<i32>} : memref<36x128xbf16, #tpu.memory_space<vmem>>, vector<4x16xbf16>,
    %c0_278 = arith.constant 0 : index
    %248 = arith.index_cast %243 : i32 to index
    %c0_279 = arith.constant 0 : index
    %c1_280 = arith.constant 1 : index
    %249 = vector.load %arg2[%c0_278, %248, %c0_279, %c1_280] : memref<1x18x4x18xbf16, #tpu.memory_space<vmem>>, vector<1x1x4x16xbf16>
    %250 = vector.shape_cast %249 : vector<1x1x4x16xbf16> to vector<4x16xbf16>
    %c28_281 = arith.constant 28 : index
    %c80_282 = arith.constant 80 : index
    %251 = vector.load %arg7[%c28_281, %c80_282] : memref<36x128xbf16, #tpu.memory_space<vmem>>, vector<4x16xbf16>
    tpu.vector_store %arg7[%c28_281, %c80_282], %250 {strides = array<i32>} : memref<36x128xbf16, #tpu.memory_space<vmem>>, vector<4x16xbf16>,
    %c0_283 = arith.constant 0 : index
    %252 = arith.index_cast %243 : i32 to index
    %c0_284 = arith.constant 0 : index
    %c2_285 = arith.constant 2 : index
    %253 = vector.load %arg2[%c0_283, %252, %c0_284, %c2_285] : memref<1x18x4x18xbf16, #tpu.memory_space<vmem>>, vector<1x1x4x16xbf16>
    %254 = vector.shape_cast %253 : vector<1x1x4x16xbf16> to vector<4x16xbf16>
    %c32_286 = arith.constant 32 : index
    %c80_287 = arith.constant 80 : index
    %255 = vector.load %arg7[%c32_286, %c80_287] : memref<36x128xbf16, #tpu.memory_space<vmem>>, vector<4x16xbf16>
    tpu.vector_store %arg7[%c32_286, %c80_287], %254 {strides = array<i32>} : memref<36x128xbf16, #tpu.memory_space<vmem>>, vector<4x16xbf16>,
    %c6_i32 = arith.constant 6 : i32
    %256 = arith.addi %3, %c6_i32 : i32
    %c0_i32_288 = arith.constant 0 : i32
    %257 = arith.addi %256, %c0_i32_288 : i32
    %c0_289 = arith.constant 0 : index
    %258 = arith.index_cast %257 : i32 to index
    %c0_290 = arith.constant 0 : index
    %c0_291 = arith.constant 0 : index
    %259 = vector.load %arg2[%c0_289, %258, %c0_290, %c0_291] : memref<1x18x4x18xbf16, #tpu.memory_space<vmem>>, vector<1x1x4x16xbf16>
    %260 = vector.shape_cast %259 : vector<1x1x4x16xbf16> to vector<4x16xbf16>
    %c0_292 = arith.constant 0 : index
    %c96 = arith.constant 96 : index
    %261 = vector.load %arg7[%c0_292, %c96] : memref<36x128xbf16, #tpu.memory_space<vmem>>, vector<4x16xbf16>
    tpu.vector_store %arg7[%c0_292, %c96], %260 {strides = array<i32>} : memref<36x128xbf16, #tpu.memory_space<vmem>>, vector<4x16xbf16>,
    %c0_293 = arith.constant 0 : index
    %262 = arith.index_cast %257 : i32 to index
    %c0_294 = arith.constant 0 : index
    %c1_295 = arith.constant 1 : index
    %263 = vector.load %arg2[%c0_293, %262, %c0_294, %c1_295] : memref<1x18x4x18xbf16, #tpu.memory_space<vmem>>, vector<1x1x4x16xbf16>
    %264 = vector.shape_cast %263 : vector<1x1x4x16xbf16> to vector<4x16xbf16>
    %c4_296 = arith.constant 4 : index
    %c96_297 = arith.constant 96 : index
    %265 = vector.load %arg7[%c4_296, %c96_297] : memref<36x128xbf16, #tpu.memory_space<vmem>>, vector<4x16xbf16>
    tpu.vector_store %arg7[%c4_296, %c96_297], %264 {strides = array<i32>} : memref<36x128xbf16, #tpu.memory_space<vmem>>, vector<4x16xbf16>,
    %c0_298 = arith.constant 0 : index
    %266 = arith.index_cast %257 : i32 to index
    %c0_299 = arith.constant 0 : index
    %c2_300 = arith.constant 2 : index
    %267 = vector.load %arg2[%c0_298, %266, %c0_299, %c2_300] : memref<1x18x4x18xbf16, #tpu.memory_space<vmem>>, vector<1x1x4x16xbf16>
    %268 = vector.shape_cast %267 : vector<1x1x4x16xbf16> to vector<4x16xbf16>
    %c8_301 = arith.constant 8 : index
    %c96_302 = arith.constant 96 : index
    %269 = vector.load %arg7[%c8_301, %c96_302] : memref<36x128xbf16, #tpu.memory_space<vmem>>, vector<4x16xbf16>
    tpu.vector_store %arg7[%c8_301, %c96_302], %268 {strides = array<i32>} : memref<36x128xbf16, #tpu.memory_space<vmem>>, vector<4x16xbf16>,
    %c6_i32_303 = arith.constant 6 : i32
    %270 = arith.addi %3, %c6_i32_303 : i32
    %c1_i32_304 = arith.constant 1 : i32
    %271 = arith.addi %270, %c1_i32_304 : i32
    %c0_305 = arith.constant 0 : index
    %272 = arith.index_cast %271 : i32 to index
    %c0_306 = arith.constant 0 : index
    %c0_307 = arith.constant 0 : index
    %273 = vector.load %arg2[%c0_305, %272, %c0_306, %c0_307] : memref<1x18x4x18xbf16, #tpu.memory_space<vmem>>, vector<1x1x4x16xbf16>
    %274 = vector.shape_cast %273 : vector<1x1x4x16xbf16> to vector<4x16xbf16>
    %c12_308 = arith.constant 12 : index
    %c96_309 = arith.constant 96 : index
    %275 = vector.load %arg7[%c12_308, %c96_309] : memref<36x128xbf16, #tpu.memory_space<vmem>>, vector<4x16xbf16>
    tpu.vector_store %arg7[%c12_308, %c96_309], %274 {strides = array<i32>} : memref<36x128xbf16, #tpu.memory_space<vmem>>, vector<4x16xbf16>,
    %c0_310 = arith.constant 0 : index
    %276 = arith.index_cast %271 : i32 to index
    %c0_311 = arith.constant 0 : index
    %c1_312 = arith.constant 1 : index
    %277 = vector.load %arg2[%c0_310, %276, %c0_311, %c1_312] : memref<1x18x4x18xbf16, #tpu.memory_space<vmem>>, vector<1x1x4x16xbf16>
    %278 = vector.shape_cast %277 : vector<1x1x4x16xbf16> to vector<4x16xbf16>
    %c16_313 = arith.constant 16 : index
    %c96_314 = arith.constant 96 : index
    %279 = vector.load %arg7[%c16_313, %c96_314] : memref<36x128xbf16, #tpu.memory_space<vmem>>, vector<4x16xbf16>
    tpu.vector_store %arg7[%c16_313, %c96_314], %278 {strides = array<i32>} : memref<36x128xbf16, #tpu.memory_space<vmem>>, vector<4x16xbf16>,
    %c0_315 = arith.constant 0 : index
    %280 = arith.index_cast %271 : i32 to index
    %c0_316 = arith.constant 0 : index
    %c2_317 = arith.constant 2 : index
    %281 = vector.load %arg2[%c0_315, %280, %c0_316, %c2_317] : memref<1x18x4x18xbf16, #tpu.memory_space<vmem>>, vector<1x1x4x16xbf16>
    %282 = vector.shape_cast %281 : vector<1x1x4x16xbf16> to vector<4x16xbf16>
    %c20_318 = arith.constant 20 : index
    %c96_319 = arith.constant 96 : index
    %283 = vector.load %arg7[%c20_318, %c96_319] : memref<36x128xbf16, #tpu.memory_space<vmem>>, vector<4x16xbf16>
    tpu.vector_store %arg7[%c20_318, %c96_319], %282 {strides = array<i32>} : memref<36x128xbf16, #tpu.memory_space<vmem>>, vector<4x16xbf16>,
    %c6_i32_320 = arith.constant 6 : i32
    %284 = arith.addi %3, %c6_i32_320 : i32
    %c2_i32_321 = arith.constant 2 : i32
    %285 = arith.addi %284, %c2_i32_321 : i32
    %c0_322 = arith.constant 0 : index
    %286 = arith.index_cast %285 : i32 to index
    %c0_323 = arith.constant 0 : index
    %c0_324 = arith.constant 0 : index
    %287 = vector.load %arg2[%c0_322, %286, %c0_323, %c0_324] : memref<1x18x4x18xbf16, #tpu.memory_space<vmem>>, vector<1x1x4x16xbf16>
    %288 = vector.shape_cast %287 : vector<1x1x4x16xbf16> to vector<4x16xbf16>
    %c24_325 = arith.constant 24 : index
    %c96_326 = arith.constant 96 : index
    %289 = vector.load %arg7[%c24_325, %c96_326] : memref<36x128xbf16, #tpu.memory_space<vmem>>, vector<4x16xbf16>
    tpu.vector_store %arg7[%c24_325, %c96_326], %288 {strides = array<i32>} : memref<36x128xbf16, #tpu.memory_space<vmem>>, vector<4x16xbf16>,
    %c0_327 = arith.constant 0 : index
    %290 = arith.index_cast %285 : i32 to index
    %c0_328 = arith.constant 0 : index
    %c1_329 = arith.constant 1 : index
    %291 = vector.load %arg2[%c0_327, %290, %c0_328, %c1_329] : memref<1x18x4x18xbf16, #tpu.memory_space<vmem>>, vector<1x1x4x16xbf16>
    %292 = vector.shape_cast %291 : vector<1x1x4x16xbf16> to vector<4x16xbf16>
    %c28_330 = arith.constant 28 : index
    %c96_331 = arith.constant 96 : index
    %293 = vector.load %arg7[%c28_330, %c96_331] : memref<36x128xbf16, #tpu.memory_space<vmem>>, vector<4x16xbf16>
    tpu.vector_store %arg7[%c28_330, %c96_331], %292 {strides = array<i32>} : memref<36x128xbf16, #tpu.memory_space<vmem>>, vector<4x16xbf16>,
    %c0_332 = arith.constant 0 : index
    %294 = arith.index_cast %285 : i32 to index
    %c0_333 = arith.constant 0 : index
    %c2_334 = arith.constant 2 : index
    %295 = vector.load %arg2[%c0_332, %294, %c0_333, %c2_334] : memref<1x18x4x18xbf16, #tpu.memory_space<vmem>>, vector<1x1x4x16xbf16>
    %296 = vector.shape_cast %295 : vector<1x1x4x16xbf16> to vector<4x16xbf16>
    %c32_335 = arith.constant 32 : index
    %c96_336 = arith.constant 96 : index
    %297 = vector.load %arg7[%c32_335, %c96_336] : memref<36x128xbf16, #tpu.memory_space<vmem>>, vector<4x16xbf16>
    tpu.vector_store %arg7[%c32_335, %c96_336], %296 {strides = array<i32>} : memref<36x128xbf16, #tpu.memory_space<vmem>>, vector<4x16xbf16>,
    %c7_i32 = arith.constant 7 : i32
    %298 = arith.addi %3, %c7_i32 : i32
    %c0_i32_337 = arith.constant 0 : i32
    %299 = arith.addi %298, %c0_i32_337 : i32
    %c0_338 = arith.constant 0 : index
    %300 = arith.index_cast %299 : i32 to index
    %c0_339 = arith.constant 0 : index
    %c0_340 = arith.constant 0 : index
    %301 = vector.load %arg2[%c0_338, %300, %c0_339, %c0_340] : memref<1x18x4x18xbf16, #tpu.memory_space<vmem>>, vector<1x1x4x16xbf16>
    %302 = vector.shape_cast %301 : vector<1x1x4x16xbf16> to vector<4x16xbf16>
    %c0_341 = arith.constant 0 : index
    %c112 = arith.constant 112 : index
    %303 = vector.load %arg7[%c0_341, %c112] : memref<36x128xbf16, #tpu.memory_space<vmem>>, vector<4x16xbf16>
    tpu.vector_store %arg7[%c0_341, %c112], %302 {strides = array<i32>} : memref<36x128xbf16, #tpu.memory_space<vmem>>, vector<4x16xbf16>,
    %c0_342 = arith.constant 0 : index
    %304 = arith.index_cast %299 : i32 to index
    %c0_343 = arith.constant 0 : index
    %c1_344 = arith.constant 1 : index
    %305 = vector.load %arg2[%c0_342, %304, %c0_343, %c1_344] : memref<1x18x4x18xbf16, #tpu.memory_space<vmem>>, vector<1x1x4x16xbf16>
    %306 = vector.shape_cast %305 : vector<1x1x4x16xbf16> to vector<4x16xbf16>
    %c4_345 = arith.constant 4 : index
    %c112_346 = arith.constant 112 : index
    %307 = vector.load %arg7[%c4_345, %c112_346] : memref<36x128xbf16, #tpu.memory_space<vmem>>, vector<4x16xbf16>
    tpu.vector_store %arg7[%c4_345, %c112_346], %306 {strides = array<i32>} : memref<36x128xbf16, #tpu.memory_space<vmem>>, vector<4x16xbf16>,
    %c0_347 = arith.constant 0 : index
    %308 = arith.index_cast %299 : i32 to index
    %c0_348 = arith.constant 0 : index
    %c2_349 = arith.constant 2 : index
    %309 = vector.load %arg2[%c0_347, %308, %c0_348, %c2_349] : memref<1x18x4x18xbf16, #tpu.memory_space<vmem>>, vector<1x1x4x16xbf16>
    %310 = vector.shape_cast %309 : vector<1x1x4x16xbf16> to vector<4x16xbf16>
    %c8_350 = arith.constant 8 : index
    %c112_351 = arith.constant 112 : index
    %311 = vector.load %arg7[%c8_350, %c112_351] : memref<36x128xbf16, #tpu.memory_space<vmem>>, vector<4x16xbf16>
    tpu.vector_store %arg7[%c8_350, %c112_351], %310 {strides = array<i32>} : memref<36x128xbf16, #tpu.memory_space<vmem>>, vector<4x16xbf16>,
    %c7_i32_352 = arith.constant 7 : i32
    %312 = arith.addi %3, %c7_i32_352 : i32
    %c1_i32_353 = arith.constant 1 : i32
    %313 = arith.addi %312, %c1_i32_353 : i32
    %c0_354 = arith.constant 0 : index
    %314 = arith.index_cast %313 : i32 to index
    %c0_355 = arith.constant 0 : index
    %c0_356 = arith.constant 0 : index
    %315 = vector.load %arg2[%c0_354, %314, %c0_355, %c0_356] : memref<1x18x4x18xbf16, #tpu.memory_space<vmem>>, vector<1x1x4x16xbf16>
    %316 = vector.shape_cast %315 : vector<1x1x4x16xbf16> to vector<4x16xbf16>
    %c12_357 = arith.constant 12 : index
    %c112_358 = arith.constant 112 : index
    %317 = vector.load %arg7[%c12_357, %c112_358] : memref<36x128xbf16, #tpu.memory_space<vmem>>, vector<4x16xbf16>
    tpu.vector_store %arg7[%c12_357, %c112_358], %316 {strides = array<i32>} : memref<36x128xbf16, #tpu.memory_space<vmem>>, vector<4x16xbf16>,
    %c0_359 = arith.constant 0 : index
    %318 = arith.index_cast %313 : i32 to index
    %c0_360 = arith.constant 0 : index
    %c1_361 = arith.constant 1 : index
    %319 = vector.load %arg2[%c0_359, %318, %c0_360, %c1_361] : memref<1x18x4x18xbf16, #tpu.memory_space<vmem>>, vector<1x1x4x16xbf16>
    %320 = vector.shape_cast %319 : vector<1x1x4x16xbf16> to vector<4x16xbf16>
    %c16_362 = arith.constant 16 : index
    %c112_363 = arith.constant 112 : index
    %321 = vector.load %arg7[%c16_362, %c112_363] : memref<36x128xbf16, #tpu.memory_space<vmem>>, vector<4x16xbf16>
    tpu.vector_store %arg7[%c16_362, %c112_363], %320 {strides = array<i32>} : memref<36x128xbf16, #tpu.memory_space<vmem>>, vector<4x16xbf16>,
    %c0_364 = arith.constant 0 : index
    %322 = arith.index_cast %313 : i32 to index
    %c0_365 = arith.constant 0 : index
    %c2_366 = arith.constant 2 : index
    %323 = vector.load %arg2[%c0_364, %322, %c0_365, %c2_366] : memref<1x18x4x18xbf16, #tpu.memory_space<vmem>>, vector<1x1x4x16xbf16>
    %324 = vector.shape_cast %323 : vector<1x1x4x16xbf16> to vector<4x16xbf16>
    %c20_367 = arith.constant 20 : index
    %c112_368 = arith.constant 112 : index
    %325 = vector.load %arg7[%c20_367, %c112_368] : memref<36x128xbf16, #tpu.memory_space<vmem>>, vector<4x16xbf16>
    tpu.vector_store %arg7[%c20_367, %c112_368], %324 {strides = array<i32>} : memref<36x128xbf16, #tpu.memory_space<vmem>>, vector<4x16xbf16>,
    %c7_i32_369 = arith.constant 7 : i32
    %326 = arith.addi %3, %c7_i32_369 : i32
    %c2_i32_370 = arith.constant 2 : i32
    %327 = arith.addi %326, %c2_i32_370 : i32
    %c0_371 = arith.constant 0 : index
    %328 = arith.index_cast %327 : i32 to index
    %c0_372 = arith.constant 0 : index
    %c0_373 = arith.constant 0 : index
    %329 = vector.load %arg2[%c0_371, %328, %c0_372, %c0_373] : memref<1x18x4x18xbf16, #tpu.memory_space<vmem>>, vector<1x1x4x16xbf16>
    %330 = vector.shape_cast %329 : vector<1x1x4x16xbf16> to vector<4x16xbf16>
    %c24_374 = arith.constant 24 : index
    %c112_375 = arith.constant 112 : index
    %331 = vector.load %arg7[%c24_374, %c112_375] : memref<36x128xbf16, #tpu.memory_space<vmem>>, vector<4x16xbf16>
    tpu.vector_store %arg7[%c24_374, %c112_375], %330 {strides = array<i32>} : memref<36x128xbf16, #tpu.memory_space<vmem>>, vector<4x16xbf16>,
    %c0_376 = arith.constant 0 : index
    %332 = arith.index_cast %327 : i32 to index
    %c0_377 = arith.constant 0 : index
    %c1_378 = arith.constant 1 : index
    %333 = vector.load %arg2[%c0_376, %332, %c0_377, %c1_378] : memref<1x18x4x18xbf16, #tpu.memory_space<vmem>>, vector<1x1x4x16xbf16>
    %334 = vector.shape_cast %333 : vector<1x1x4x16xbf16> to vector<4x16xbf16>
    %c28_379 = arith.constant 28 : index
    %c112_380 = arith.constant 112 : index
    %335 = vector.load %arg7[%c28_379, %c112_380] : memref<36x128xbf16, #tpu.memory_space<vmem>>, vector<4x16xbf16>
    tpu.vector_store %arg7[%c28_379, %c112_380], %334 {strides = array<i32>} : memref<36x128xbf16, #tpu.memory_space<vmem>>, vector<4x16xbf16>,
    %c0_381 = arith.constant 0 : index
    %336 = arith.index_cast %327 : i32 to index
    %c0_382 = arith.constant 0 : index
    %c2_383 = arith.constant 2 : index
    %337 = vector.load %arg2[%c0_381, %336, %c0_382, %c2_383] : memref<1x18x4x18xbf16, #tpu.memory_space<vmem>>, vector<1x1x4x16xbf16>
    %338 = vector.shape_cast %337 : vector<1x1x4x16xbf16> to vector<4x16xbf16>
    %c32_384 = arith.constant 32 : index
    %c112_385 = arith.constant 112 : index
    %339 = vector.load %arg7[%c32_384, %c112_385] : memref<36x128xbf16, #tpu.memory_space<vmem>>, vector<4x16xbf16>
    tpu.vector_store %arg7[%c32_384, %c112_385], %338 {strides = array<i32>} : memref<36x128xbf16, #tpu.memory_space<vmem>>, vector<4x16xbf16>,
    %c0_386 = arith.constant 0 : index
    %c0_387 = arith.constant 0 : index
    %340 = vector.load %arg8[%c0_386, %c0_387] : memref<8x36xbf16, #tpu.memory_space<vmem>>, vector<8x36xbf16>
    %c0_388 = arith.constant 0 : index
    %c0_389 = arith.constant 0 : index
    %341 = vector.load %arg7[%c0_388, %c0_389] : memref<36x128xbf16, #tpu.memory_space<vmem>>, vector<36x128xbf16>
    %cst = arith.constant dense<0.000000e+00> : vector<8x128xf32>
    %342 = tpu.matmul %340, %341, %cst {dimension_numbers = #tpu.dot_dimension_numbers<[1], [0], [0], [1], [0, 0, 1, 1], [], []>} : vector<8x36xbf16>, vector<36x128xbf16>, vector<8x128xf32> -> vector<8x128xf32>
    %c0_390 = arith.constant 0 : index
    %c0_391 = arith.constant 0 : index
    %343 = vector.load %arg9[%c0_390, %c0_391] : memref<8x1xf32, #tpu.memory_space<vmem>>, vector<8x1xf32>
    %344 = vector.broadcast %343 : vector<8x1xf32> to vector<8x128xf32>
    %345 = arith.mulf %342, %344 : vector<8x128xf32>
    %c0_392 = arith.constant 0 : index
    %c0_393 = arith.constant 0 : index
    %346 = vector.load %arg5[%c0_392, %c0_393] : memref<8x1xf32, #tpu.memory_space<vmem>>, vector<8x1xf32>
    %347 = vector.broadcast %346 : vector<8x1xf32> to vector<8x128xf32>
    %348 = arith.addf %345, %347 : vector<8x128xf32>
    %c0_394 = arith.constant 0 : index
    %c0_395 = arith.constant 0 : index
    %c0_396 = arith.constant 0 : index
    %349 = vector.load %arg6[%c0_394, %c0_395, %c0_396] : memref<1x8x128xf32, #tpu.memory_space<vmem>>, vector<1x8x128xf32>
    %350 = vector.shape_cast %349 : vector<1x8x128xf32> to vector<8x128xf32>
    %351 = vector.shape_cast %348 : vector<8x128xf32> to vector<1x8x128xf32>
    tpu.vector_store %arg6[%c0_394, %c0_395, %c0_396], %351 {strides = array<i32>} : memref<1x8x128xf32, #tpu.memory_space<vmem>>, vector<1x8x128xf32>,
    return
  }
  func.func @transform_0(%arg0: i32, %arg1: i32) -> (i32, i32, i32, i32) {
    %c0_i32 = arith.constant 0 : i32
    %c0_i32_0 = arith.constant 0 : i32
    %c0_i32_1 = arith.constant 0 : i32
    %c0_i32_2 = arith.constant 0 : i32
    return %arg0, %c0_i32, %c0_i32_0, %c0_i32_1 : i32, i32, i32, i32
  }
  func.func @transform_1(%arg0: i32, %arg1: i32) -> (i32, i32) {
    %c0_i32 = arith.constant 0 : i32
    %c0_i32_0 = arith.constant 0 : i32
    %c0_i32_1 = arith.constant 0 : i32
    return %c0_i32, %c0_i32_0 : i32, i32
  }
  func.func @transform_2(%arg0: i32, %arg1: i32) -> (i32, i32) {
    %c0_i32 = arith.constant 0 : i32
    %c0_i32_0 = arith.constant 0 : i32
    %c0_i32_1 = arith.constant 0 : i32
    return %c0_i32, %c0_i32_0 : i32, i32
  }
  func.func @transform_3(%arg0: i32, %arg1: i32) -> (i32, i32) {
    %c0_i32 = arith.constant 0 : i32
    %c0_i32_0 = arith.constant 0 : i32
    %c0_i32_1 = arith.constant 0 : i32
    return %c0_i32, %c0_i32_0 : i32, i32
  }
  func.func @transform_4(%arg0: i32, %arg1: i32) -> (i32, i32, i32) {
    %c0_i32 = arith.constant 0 : i32
    %c0_i32_0 = arith.constant 0 : i32
    return %arg0, %c0_i32, %arg1 : i32, i32, i32
  }
}

</mosaic_0001>

<bundles_post_ra>
// kernel: tpu_custom_call.1
= control target key start
LH: loop header
LB: loop body
LE: loop exit
PB: predicated region body
PF: predicated region fallthrough
CT: control target
= control target key end

     0   :  { %9 = vsyncpa [#allocation6], 0  ;;  %s2598_s0 = inlined_call_operand.hbm [shape: bf16[2,18,4,18], index: 0, kind: input, shape index: {}]   ;;  %s2599_s1 = inlined_call_operand.vmem [shape: f32[8,36], index: 1, kind: input, shape index: {}]   ;;  %s2600_s2 = inlined_call_operand.vmem [shape: f32[8,1], index: 2, kind: input, shape index: {}]   ;;  %s2601_s3 = inlined_call_operand.vmem [shape: f32[8,1], index: 3, kind: input, shape index: {}]   ;;  %s2602_s4 = inlined_call_operand.hbm [shape: f32[2,8,256], index: 4, kind: output, shape index: {}]  }
   0x1   :  { %11 = vsyncpa [#allocation6 + $0x1], 0 }
   0x2   :  { %12 = vsyncpa [#allocation7], 0 }
   0x3   :  { %14 = vsyncpa [#allocation7 + $0x1], 0  ;;  %s2007_s15 = smov 0   ;;  %s2009_s16 = smov 0  }
   0x4   :  { %s2011_s17 = smov 0   ;;  %s2013_s18 = smov 0  }
   0x5   :  { %s2015_s19 = smov 0   ;;  %s2017_s20 = smov 0  }
   0x6   :  { %s2019_s21 = smov 0   ;;  %s2021_s22 = smov 0  }
   0x7   :  { %s2023_s23 = smov 0   ;;  %s2025_s24 = smov 0  }
   0x8   :  { %s2027_s25 = smov 0  }
   0x9 LB: > { %2614 = sst [smem:[#allocation11_spill]] %s1941_s23  ;;  %s1460_s26 = sadd.s32 4294967295, %s1949_s25   ;;  %s1949_s25 = sphi %s2027_s25, %s20_s25   ;;  %s1945_s24 = sphi %s2025_s24, %s2635_s24   ;;  %s1941_s23 = sphi %s2023_s23, %s2634_s23   ;;  %s1937_s22 = sphi %s2021_s22, %s2633_s22   ;;  %s1933_s21 = sphi %s2019_s21, %s2632_s21   ;;  %s1929_s20 = sphi %s2017_s20, %s2641_s20   ;;  %s1925_s19 = sphi %s2015_s19, %s2640_s19   ;;  %s1921_s18 = sphi %s2013_s18, %s2639_s18   ;;  %s1917_s17 = sphi %s2011_s17, %s2638_s17   ;;  %s1913_s16 = sphi %s2009_s16, %s2637_s16   ;;  %s1909_s15 = sphi %s2007_s15, %s2636_s15  }
   0xa   : > { %2615 = sst [smem:[#allocation12_spill]] %s1945_s24  ;;  %s1461_s27 = sadd.s32 4294967294, %s1949_s25  }
   0xb   : > { %s29_s28 = sadd.s32 1, %s1941_s23  ;;  %s32_s29 = sadd.s32 1, %s1945_s24 }
   0xc   : > { %p30_p0 = scmp.ge.s32.totalorder %s29_s28, 2  ;;  %s39_s30 = sadd.s32 1, %s1929_s20 }
   0xd   : > { %p46_p1 = scmp.ne.s32.totalorder %s1929_s20, %s1925_s19  ;;  %p47_p2 = scmp.eq.s32.totalorder %s1949_s25, 0 }
   0xe   : > { %s2643_s28 = smov (%p30_p0, %s29_s28), 0  ;;  %s2645_s29 = smov (!%p30_p0, %s32_s29), %s1945_s24 }
   0xf   : > { %2616 = sst [smem:[#allocation13_spill]] %s2643_s28  ;;  %p2071_p3 = por %p47_p2, %p46_p1 }
  0x10   : > { %p52_p4 = scmp.ne.s32.totalorder %s1925_s19, %s1921_s18  ;;  %p34_p5 = scmp.ge.s32.totalorder %s2645_s29, 2 }
  0x11   : > { %p53_p6 = scmp.eq.s32.totalorder %s1460_s26, 0  ;;  %s126_s6 = ssub.s32 %s1941_s23, %s2643_s28 }
  0x12   : > { %s130_s7 = sadd.s32 1, %s1917_s17  ;;  %s2647_s29 = smov (%p34_p5, %s2645_s29), 0 }
  0x13   : > { %2618 = sst [smem:[#allocation14_spill]] %s2647_s29  ;;  %p2081_p7 = por %p53_p6, %p52_p4 }
  0x14   : > { %p140_p8 = scmp.ne.s32.totalorder %s1917_s17, %s1913_s16  ;;  %s36_s9 = ssub.s32 %s1945_s24, %s2647_s29 }
  0x15   : > { %p141_p9 = scmp.eq.s32.totalorder %s1460_s26, 3  ;;  %p37_p10 = scmp.eq.s32.totalorder %s36_s9, 0 }
  0x16   : > { %s127_s10 = sor.u32 %s126_s6, %s36_s9  ;;  %p146_p13 = scmp.ne.s32.totalorder %s1913_s16, %s1909_s15 }
  0x17   : > { %p128_p11 = scmp.eq.s32.totalorder %s127_s10, 0  ;;  %p2089_p12 = por %p141_p9, %p140_p8 }
  0x18   : > { %s2094_s12 = scalar_select %p37_p10, %s1929_s20, %s39_s30  }
  0x19   : > { %s2097_s13 = scalar_select %p128_p11, %s1917_s17, %s130_s7  }
  0x1a   : > { %2621 = sst [smem:[#allocation15_spill]] %s2094_s12  ;;  %p147_p0 = scmp.eq.s32.totalorder %s1461_s27, 3 }
  0x1b   : > { %p1643_p1 = scmp.lt.s32.totalorder %s1949_s25, 4  ;;  %s176_s18 = sand.u32 1, %s1929_s20  }
  0x1c   : > { %p2102_p2 = por %p147_p0, %p146_p13  ;;  %s1628_s26 = smul.u32 36, %s176_s18 }
  0x1d   : > { %s1629_s6 = smul.u32 576, %s1945_s24  ;;  %p2110_p4 = pnand %p1643_p1, %p2071_p3 }
  0x1e   : > { %s180_s29 = scalar_lea.vmem [#allocation5], %s1628_s26  ;;  %p1465_p5 = scmp.ge.s32.totalorder %s1949_s25, 1 }
  0x1f   : > { %s186_s7 = scalar_lea.hbm %s2598_s0, %s1629_s6  ;;  %s187_s27 = sshll.u32 %s180_s29, 4  ;;  %s188_s27 = int_to_ptr.vmem [resolvable:$true] %s187_s27 }
  0x20   : > { %s177_s28 = scalar_lea.sflag [#allocation6], %s176_s18  ;;  %p1803_p6 = pneg %p2110_p4 }
  0x21   : > { %s1814_s23 = scalar_lea.vmem %s188_s27, 576  ;;  %s1951_s5 = smov [#allocation5]  }
  0x22   : > { %p1815_p8 = scmp.ne.s32.totalorder %s188_s27, %s1814_s23  ;;  %s1819_s24 = sshll.u32 %s1951_s5, 4  ;;  %s1820_s24 = int_to_ptr.vmem [resolvable:$false] %s1819_s24 }
  0x23   : > { %s1821_s12 = scalar_lea.vmem %s1820_s24, 1152  ;;  %p1822_p3 = scmp.lt.s32.totalorder %s188_s27, %s1820_s24 }
  0x24   : > { %p1817_p9 = pnand %p1815_p8, %p1803_p6  ;;  %p1823_p11 = scmp.lt.s32.totalorder %s1821_s12, %s1814_s23 }
  0x26   : > { %p1818_p10 = pneg %p1817_p9  ;;  %p1824_p13 = por %p1823_p11, %p1822_p3 }
  0x28   : > { %p1825_p0 = pnand %p1824_p13, %p1818_p10 }
  0x2a   : > { %1828 = shalt.err (!%p1825_p0)
}
  0x2b   : > { %s1952_s26 = smov 32   ;;  %s1953_s29 = smov 2  }
  0x2c   : > { %1638 = dma.hbm_to_vmem [thread:$0]  (!%p2110_p4), %s186_s7, 576, %s188_s27, %s177_s28, %s1952_s26, %s1952_s26, %s1953_s29  }
  0x2d   : > { %p195_p1 = scmp.lt.s32.totalorder %s1949_s25, 5 }
  0x2f   : > { %p196_p6 = pnand %p1465_p5, %p195_p1 }
  0x30   : > { %s201_s18 = sand.u32 (!%p196_p6), 1, %s1925_s19  }
  0x31   : > { %199 = sbr.rel (%p196_p6) target bundleno = 697 (0x2b9), region = 36  ;;  %s202_s23 = scalar_lea.sflag (!%p196_p6), [#allocation6], %s201_s18 }
  0x32   : > { %s2126_s6 = smul.u32 (!%p196_p6), 36, %s201_s18 }
  0x34   : > { %s205_s24 = scalar_lea.vmem (!%p196_p6), [#allocation5], %s2126_s6 }
  0x36   : > { %1900 = dma.done.wait (%p2081_p7), %s202_s23, 576  }
  0x37   : > { %1902 = vsyncadd (%p2081_p7), %s202_s23, 4294966720  ;;  %s2607_s28 = sand.u32 1, %s1913_s16   ;;  %p1467_p4 = scmp.ne.s32.totalorder %s1933_s21, 0 }
  0x38   : > { %s2136_s12 = sshll.u32 %s2607_s28, 3 }
  0x39   : > { %234 = sbr.rel (%p1467_p4) target bundleno = 221 (0xdd), region = 44 }
  0x3e   : > { %v235_v0 = vld [vmem:[%s2599_s1] sm:$0xff]  ;;  %vm238_vm0 = vcmask 293888   ;;  %vm247_vm1 = vcmask 289792   ;;  %vm244_vm2 = vcmask 7168  }
  0x3f   : > { %v237_v1 = vmul.f32 %v235_v0, %v235_v0  ;;  %v246_v2 = vpack.c.bf16 %v235_v0, %v235_v0  ;;  %v236_v5 = vld [vmem:[%s2600_s2] sm:$0xff] }
  0x41   : > { %v239_v3 = vsel %vm238_vm0, %v237_v1, 0.0  ;;  %248 = vst.msk [vmem:[#allocation3] sm:$0xf] %vm247_vm1, %v246_v2 }
  0x42   : > { %240 = vadd.xlane.f32.xlu0 %v239_v3 }
  0xcb   : > { %v241_v4 = vpop.xlane.xlu0 %240 }
  0xcc   : > { %1762 = vrsqrt.f32 %v241_v4 }
  0xd9   : > { %v1763_v6 = vpop.eup %1762 }
  0xda   : > { %v243_v7 = vmul.f32 %v1763_v6, %v236_v5 }
  0xdc   : > { %245 = vst.msk [vmem:[#allocation4] sm:$0xff] %vm244_vm2, %v243_v7 }
  0xdd PF: > { %s1604_s27 = sshll.u32 %s1933_s21, 4  ;;  %v261_v8 = vlaneseq  ;;  %v1954_v9 = vmov 1983009808   ;;  %s1955_s26 = smov 126   ;;  %v1967_v56 = vmov 0.0   ;;  %vm253_vm3 = vcmask 123904  }
  0xde   : > { %s2147_s5 = scalar_lea.vmem %s205_s24, %s1604_s27 [#allocation5]  ;;  %v259_v10 = vunpack.c.l.s4 %v1954_v9  ;;  %s1956_s29 = smov 30   ;;  %1618 = vmatprep.subr.bf16.mxu0 %v1967_v56  ;;  %vm268_vm4 = vcmask 125954   ;;  %vm369_vm5 = vcmask 255104   ;;  %vm495_vm6 = vcmask 386304  }
  0xdf   : > { %v2150_v11 = vld.sshfl [vmem:[%s2147_s5 + $0x4] sm:$0x3 pattern:$0x76325410]  ;;  %v262_v14 = vshrl.u32 %v261_v8, 7  ;;  %s1957_s18 = smov 14  }
  0xe0   : > { %353 = vrot.lane.b32.xlu0 %v2150_v11, %s1955_s26  ;;  %v2155_v12 = vld.sshfl [vmem:[%s2147_s5 + $0x8] sm:$0x3 pattern:$0x76325410]  ;;  %v260_v13 = vunpack.c.0.s8 %v259_v10  ;;  %s2612_s6 = smov 46   ;;  %s1959_s23 = smov 62  }
  0xe1   : > { %605 = vrot.lane.b32.xlu1 %v2155_v12, %s1956_s29  ;;  %v2160_v15 = vld.sshfl [vmem:[%s2147_s5 + $0x6] sm:$0x3 pattern:$0x76325410]  ;;  %s1960_s24 = smov 127   ;;  %s1961_s10 = smov 78  }
  0xe2   : > { %v2163_v16 = vld.sshfl [vmem:[%s2147_s5 + $0xa] sm:$0x3 pattern:$0x76325410]  ;;  %v2170_v18 = vsub.s32 %v260_v13, %v262_v14  ;;  %s1962_s30 = smov 15   ;;  %s1963_s8 = smov 16  }
  0xe3   : > { %v2166_v17 = vld.sshfl [vmem:[%s2147_s5 + $0xc] sm:$0x3 pattern:$0x76325410]  ;;  %s2608_s7 = smov 94   ;;  %s1965_s27 = smov 31  }
  0xe4   : > { %479 = vrot.lane.b32.xlu0 %v2160_v15, %s1957_s18  ;;  %v1766_v19 = vld [vmem:[%s2147_s5 + $0x2] ss:$0 sps:$4 sm:$0x33]   ;;  %v1767_v20 = vld [vmem:[%s2147_s5 + $0x4] ss:$0 sps:$4 sm:$0x33]  }
  0xe5   : > { %731 = vrot.lane.b32.xlu1 %v2163_v16, %s2612_s6  ;;  %v2177_v21 = vld.sshfl [vmem:[%s2147_s5 + $0x2] sm:$0x3 pattern:$0x76325410]  ;;  %v320_v22 = vrot.slane %v1766_v19, %v2170_v18  ;;  %v339_v23 = vrot.slane %v1767_v20, %v2170_v18  ;;  %s1966_s28 = smov 32   ;;  %s2610_s9 = smov 110  }
  0xe6   : > { %v1768_v24 = vld [vmem:[%s2147_s5 + $0x4] ss:$0 sps:$4 sm:$0x33]   ;;  %v1769_v27 = vld [vmem:[%s2147_s5 + $0x6] ss:$0 sps:$4 sm:$0x33]  }
  0xe7   : > { %v2188_v25 = vld.sshfl [vmem:[%s2147_s5 + $0xe] sm:$0x3 pattern:$0x76325410]  ;;  %v435_v26 = vrot.slane %v1768_v24, %v2170_v18  ;;  %v465_v28 = vrot.slane %v1769_v27, %v2170_v18  ;;  %v1479_v7 = vld [vmem:[%s2147_s5 + $0x4] sm:$0x3] }
  0xe8   : > { %857 = vrot.lane.b32.xlu0 %v2166_v17, %s1959_s23  ;;  %v2200_v29 = vld.sshfl [vmem:[%s2147_s5 + $0x10] sm:$0x3 pattern:$0x76325410]  ;;  %329 = vst.msk [vmem:[#allocation2 + $0xc] sm:$0x3] %vm253_vm3, %v1479_v7 }
  0xe9   : > { %307 = vrot.lane.b32.xlu1 %v2177_v21, %s1960_s24  ;;  %v1770_v30 = vld [vmem:[%s2147_s5 + $0x6] ss:$0 sps:$4 sm:$0x33]   ;;  %v2206_v31 = vld [vmem:[%s2147_s5 + $0x4] ss:$0 sps:$4 sm:$0x33]  }
  0xea   : > { %v1771_v32 = vld [vmem:[%s2147_s5 + $0x8] ss:$0 sps:$4 sm:$0x33]   ;;  %v2210_v33 = vld [vmem:[%s2147_s5 + $0x6] ss:$0 sps:$4 sm:$0x33]   ;;  %v506_v34 = vrot.slane %v2206_v31, %v2170_v18  ;;  %v561_v36 = vrot.slane %v1770_v30, %v2170_v18 }
  0xeb   : > { %v2216_v35 = vld [vmem:[%s2147_s5 + $0xe] ss:$0 sps:$4 sm:$0x33]   ;;  %v534_v37 = vrot.slane %v2210_v33, %v2170_v18  ;;  %v2224_v38 = vld [vmem:[%s2147_s5 + $0x10] ss:$0 sps:$4 sm:$0x33]   ;;  %v591_v45 = vrot.slane %v1771_v32, %v2170_v18 }
  0xec   : > { %321 = vrot.lane.b32.xlu0 %v320_v22, %s1955_s26  ;;  %v1065_v39 = vrot.slane %v2216_v35, %v2170_v18  ;;  %v2229_v40 = vld [vmem:[%s2147_s5 + $0x6] ss:$0 sps:$4 sm:$0x33]   ;;  %v1095_v41 = vrot.slane %v2224_v38, %v2170_v18  ;;  %v2234_v42 = vld [vmem:[%s2147_s5 + $0x8] ss:$0 sps:$4 sm:$0x33]  }
  0xed   : > { %340 = vrot.lane.b32.xlu1 %v339_v23, %s1960_s24  ;;  %v632_v43 = vrot.slane %v2229_v40, %v2170_v18  ;;  %v2241_v44 = vld [vmem:[%s2147_s5 + $0x10] ss:$0 sps:$4 sm:$0x33]   ;;  %v660_v46 = vrot.slane %v2234_v42, %v2170_v18  ;;  %v2248_v47 = vld [vmem:[%s2147_s5 + $0x12] ss:$0 sps:$4 sm:$0x33]  }
  0xee   : > { %v1772_v48 = vld [vmem:[%s2147_s5 + $0x8] ss:$0 sps:$4 sm:$0x33]   ;;  %v1191_v49 = vrot.slane %v2241_v44, %v2170_v18  ;;  %v1221_v52 = vrot.slane %v2248_v47, %v2170_v18  ;;  %v2262_v53 = vld [vmem:[%s2147_s5 + $0xa] ss:$0 sps:$4 sm:$0x33]  }
  0xef   : > { %v2254_v50 = vld [vmem:[%s2147_s5 + $0x8] ss:$0 sps:$4 sm:$0x33]   ;;  %v2269_v55 = vld [vmem:[%s2147_s5 + $0xa] ss:$0 sps:$4 sm:$0x33]   ;;  %v786_v57 = vrot.slane %v2262_v53, %v2170_v18  ;;  %v687_v1 = vrot.slane %v1772_v48, %v2170_v18 }
  0xf0   : > { %983 = vrot.lane.b32.xlu0 %v2188_v25, %s1961_s10  ;;  %v2257_v51 = vld.sshfl [vmem:[%s2147_s5 + $0x12] sm:$0x3 pattern:$0x76325410]  ;;  %v758_v54 = vrot.slane %v2254_v50, %v2170_v18  ;;  %v884_v60 = vrot.slane %v2269_v55, %v2170_v18  ;;  %v252_v19 = vld [vmem:[%s2147_s5] sm:$0x3] }
  0xf1   : > { %422 = vrot.lane.b32.xlu1 %v2150_v11, %s1962_s30  ;;  %v2276_v58 = vld [vmem:[%s2147_s5 + $0xc] ss:$0 sps:$4 sm:$0x33]   ;;  %v1773_v59 = vld [vmem:[%s2147_s5 + $0xa] ss:$0 sps:$4 sm:$0x33]  }
  0xf2   : > { %v2282_v61 = vld [vmem:[%s2147_s5 + $0xc] ss:$0 sps:$4 sm:$0x33]   ;;  %v1774_v62 = vld [vmem:[%s2147_s5] ss:$0 sps:$4 sm:$0x33]   ;;  %v912_v63 = vrot.slane %v2276_v58, %v2170_v18  ;;  %v717_v9 = vrot.slane %v1773_v59, %v2170_v18 }
  0xf3   : > { %v2288_v0 = vld [vmem:[%s2147_s5 + $0xe] ss:$0 sps:$4 sm:$0x33]   ;;  %v1010_v2 = vrot.slane %v2282_v61, %v2170_v18  ;;  %v2303_v5 = vld [vmem:[%s2147_s5 + $0x10] ss:$0 sps:$4 sm:$0x33]   ;;  %v264_v10 = vrot.slane %v1774_v62, %v2170_v18 }
  0xf4   : > { %436 = vrot.lane.b32.xlu0 %v435_v26, %s1957_s18  ;;  %v2296_v3 = vld [vmem:[%s2147_s5 + $0xe] ss:$0 sps:$4 sm:$0x33]   ;;  %v1038_v4 = vrot.slane %v2288_v0, %v2170_v18  ;;  %v1164_v8 = vrot.slane %v2303_v5, %v2170_v18  ;;  %v1775_v13 = vld [vmem:[%s2147_s5 + $0xa] ss:$0 sps:$4 sm:$0x33]  }
  0xf5   : > { %452 = vrot.lane.b32.xlu1 %v2160_v15, %s1963_s8  ;;  %v1136_v6 = vrot.slane %v2296_v3, %v2170_v18  ;;  %v1470_v14 = vld.sshfl [vmem:[%s2147_s5] sm:$0x3 pattern:$0x76325410]  ;;  %254 = vst.msk [vmem:[#allocation2] sm:$0x3] %vm253_vm3, %v252_v19  ;;  %v813_v22 = vrot.slane %v1775_v13, %v2170_v18 }
  0xf6   : > { %v1798_v20 = vld [vmem:[%s2147_s5 + $0x2] ss:$0 sps:$4 sm:$0x33]   ;;  %v1776_v23 = vld [vmem:[%s2147_s5 + $0xc] ss:$0 sps:$4 sm:$0x33]  }
  0xf7   : > { %v295_v24 = vrot.slane %v1798_v20, %v2170_v18  ;;  %v843_v26 = vrot.slane %v1776_v23, %v2170_v18  ;;  %v1777_v27 = vld [vmem:[%s2147_s5 + $0x2] ss:$0 sps:$4 sm:$0x33]   ;;  %v1778_v30 = vld [vmem:[%s2147_s5 + $0x4] ss:$0 sps:$4 sm:$0x33]  }
  0xf8   : > { %466 = vrot.lane.b32.xlu0 %v465_v28, %s1962_s30  ;;  %v380_v28 = vrot.slane %v1777_v27, %v2170_v18  ;;  %v408_v32 = vrot.slane %v1778_v30, %v2170_v18  ;;  %v1780_v48 = vld [vmem:[%s2147_s5 + $0xe] ss:$0 sps:$4 sm:$0x33]   ;;  %vm621_vm7 = vcmask 517504   ;;  %vm747_vm8 = vcmask 648704   ;;  %v1308_v38 = vld [vmem:[#allocation4] sm:$0xff] }
  0xf9   : > { %1109 = vrot.lane.b32.xlu1 %v2200_v29, %s2608_s7  ;;  %s1969_s7 = smov 47   ;;  %297 = vst.msk [vmem:[#allocation2 + $0x4] sm:$0xc] %vm268_vm4, %v295_v24  ;;  %v969_v59 = vrot.slane %v1780_v48, %v2170_v18  ;;  %vm873_vm9 = vcmask 779904   ;;  %vm384_vm10 = vcmask 257154   ;;  %vm1979_vm11 = vmmov 0  }
  0xfa   : > { %1624 = vmatprep.mubr.msk.bf16.mxu0 %vm1979_vm11, %v1967_v56  ;;  %vm999_vm12 = vcmask 911104   ;;  %vm510_vm13 = vcmask 388354   ;;  %vm1125_vm14 = vcmask 1042304   ;;  %vm636_vm15 = vcmask 519554  }
  0xfb   : > { %vm1264_vm0 = vcmask 1041408   ;;  %vm762_vm1 = vcmask 650754   ;;  %vm888_vm2 = vcmask 781954  }
  0xfc   : > { %548 = vrot.lane.b32.xlu0 %v2160_v15, %s1965_s27 }
  0xfd   : > { %562 = vrot.lane.b32.xlu1 %v561_v36, %s1956_s29  ;;  %v1779_v36 = vld [vmem:[%s2147_s5 + $0xc] ss:$0 sps:$4 sm:$0x33]   ;;  %s2613_s5 = smov 95  }
 0x100   : > { %578 = vrot.lane.b32.xlu0 %v2155_v12, %s1966_s28 }
 0x101   : > { %592 = vrot.lane.b32.xlu1 %v591_v45, %s1965_s27  ;;  %v939_v45 = vrot.slane %v1779_v36, %v2170_v18 }
 0x104   : > { %1235 = vrot.lane.b32.xlu0 %v2257_v51, %s2610_s9  ;;  %s1970_s9 = smov 48  }
 0x105   : > { %674 = vrot.lane.b32.xlu1 %v2155_v12, %s1969_s7 }
 0x108   : > { %688 = vrot.lane.b32.xlu0 %v687_v1, %s2612_s6  ;;  %s1971_s6 = smov 63  }
 0x109   : > { %704 = vrot.lane.b32.xlu1 %v2163_v16, %s1970_s9 }
 0x10c   : > { %718 = vrot.lane.b32.xlu0 %v717_v9, %s1969_s7 }
 0x10d   : > { %265 = vrot.lane.b32.xlu1 %v264_v10, %s1960_s24  ;;  %s1973_s24 = smov 79  }
 0x110   : > { %279 = vrot.lane.b32.xlu0 %v1470_v14, %s1955_s26  ;;  %s1972_s26 = smov 64  }
 0x111   : > { %800 = vrot.lane.b32.xlu1 %v2163_v16, %s1971_s6 }
 0x114   : > { %814 = vrot.lane.b32.xlu0 %v813_v22, %s1959_s23 }
 0x115   : > { %830 = vrot.lane.b32.xlu1 %v2166_v17, %s1972_s26 }
 0x118   : > { %844 = vrot.lane.b32.xlu0 %v843_v26, %s1971_s6 }
 0x119   : > { %366 = vrot.lane.b32.xlu1 %v2177_v21, %s1963_s8 }
 0x11c   : > { %381 = vrot.lane.b32.xlu0 %v380_v28, %s1962_s30  ;;  %s1974_s30 = smov 80  }
 0x11d   : > { %395 = vrot.lane.b32.xlu1 %v2177_v21, %s1957_s18  ;;  %s2624_s18 = smov 94  }
 0x120   : > { %409 = vrot.lane.b32.xlu0 %v408_v32, %s1963_s8  ;;  %s1976_s8 = smov 96  }
 0x121   : > { %926 = vrot.lane.b32.xlu1 %v2166_v17, %s1973_s24 }
 0x124   : > { %940 = vrot.lane.b32.xlu0 %v939_v45, %s1961_s10 }
 0x125   : > { %956 = vrot.lane.b32.xlu1 %v2188_v25, %s1974_s30 }
 0x128   : > { %970 = vrot.lane.b32.xlu0 %v969_v59, %s1973_s24 }
 0x129   : > { %492 = vrot.lane.b32.xlu1 %v2150_v11, %s1966_s28 }
 0x12c   : > { %507 = vrot.lane.b32.xlu0 %v506_v34, %s1965_s27  ;;  %s2626_s27 = smov 110  }
 0x12d   : > { %521 = vrot.lane.b32.xlu1 %v2150_v11, %s1956_s29  ;;  %s1977_s29 = smov 111  }
 0x130   : > { %535 = vrot.lane.b32.xlu0 %v534_v37, %s1966_s28  ;;  %s2625_s28 = smov 46  }
 0x131   : > { %1052 = vrot.lane.b32.xlu1 %v2188_v25, %s2613_s5 }
 0x134   : > { %1066 = vrot.lane.b32.xlu0 %v1065_v39, %s2624_s18  ;;  %v1980_v39 = vmov 0  }
 0x135   : > { %1082 = vrot.lane.b32.xlu1 %v2200_v29, %s1976_s8  ;;  %1765 = vset.pattern.permute.xlu0 %v1980_v39 }
 0x136   : > { %1764 = vset.pattern.permute.xlu1 %v1980_v39 }
 0x138   : > { %1096 = vrot.lane.b32.xlu0 %v1095_v41, %s2613_s5  ;;  %s1978_s5 = smov 112  }
 0x139   : > { %618 = vrot.lane.b32.xlu1 %v2160_v15, %s1970_s9 }
 0x13c   : > { %633 = vrot.lane.b32.xlu0 %v632_v43, %s1969_s7 }
 0x13d   : > { %647 = vrot.lane.b32.xlu1 %v2160_v15, %s2625_s28 }
 0x140   : > { %661 = vrot.lane.b32.xlu0 %v660_v46, %s1970_s9  ;;  %s2627_s9 = smov 95  }
 0x141   : > { %1178 = vrot.lane.b32.xlu1 %v2200_v29, %s1977_s29 }
 0x144   : > { %1192 = vrot.lane.b32.xlu0 %v1191_v49, %s2626_s27 }
 0x145   : > { %1208 = vrot.lane.b32.xlu1 %v2257_v51, %s1978_s5 }
 0x148   : > { %1222 = vrot.lane.b32.xlu0 %v1221_v52, %s1977_s29 }
 0x149   : > { %744 = vrot.lane.b32.xlu1 %v2155_v12, %s1972_s26 }
 0x14c   : > { %759 = vrot.lane.b32.xlu0 %v758_v54, %s1971_s6 }
 0x14d   : > { %773 = vrot.lane.b32.xlu1 %v2155_v12, %s1959_s23 }
 0x150   : > { %787 = vrot.lane.b32.xlu0 %v786_v57, %s1972_s26 }
 0x151   : > { %870 = vrot.lane.b32.xlu1 %v2163_v16, %s1974_s30 }
 0x152   : > { %v354_v11 = vpop.permute.xlu0 %353 }
 0x153   : > { %356 = vst.msk [vmem:[#allocation2 + $0x10] sm:$0x3] %vm253_vm3, %v354_v11  ;;  %v606_v15 = vpop.permute.xlu1 %605 }
 0x154   : > { %885 = vrot.lane.b32.xlu0 %v884_v60, %s1973_s24  ;;  %s2628_s24 = scalar_lea.vmem [#allocation8], %s2136_s12 }
 0x155   : > { %899 = vrot.lane.b32.xlu1 %v2163_v16, %s1961_s10  ;;  %s1600_s10 = sshll.u32 %s1937_s22, 1  ;;  %s2630_s22 = sand.u32 1, %s1913_s16  }
 0x156   : > { %v480_v12 = vpop.permute.xlu0 %479  ;;  %s1335_s7 = sadd.s32 %s1933_s21, %s1600_s10  ;;  %s2629_s21 = smov %s2628_s24 }
 0x157   : > { %482 = vst.msk [vmem:[#allocation2 + $0x10] sm:$0x3] %vm369_vm5, %v480_v12  ;;  %v732_v21 = vpop.permute.xlu1 %731  ;;  %s1601_s26 = sshll.u32 %s1335_s7, 7  ;;  %s1324_s28 = scalar_lea.sflag [#allocation7], %s2630_s22 }
 0x158   : > { %913 = vrot.lane.b32.xlu0 %v912_v63, %s1974_s30  ;;  %608 = vst.msk [vmem:[#allocation2 + $0x10] sm:$0x3] %vm495_vm6, %v606_v15  ;;  %s1339_s30 = sshll.u32 %s2628_s24, 4  ;;  %s2535_s30 = int_to_ptr.vmem [resolvable:$true] %s1339_s30 }
 0x159   : > { %734 = vst.msk [vmem:[#allocation2 + $0x10] sm:$0x3] %vm621_vm7, %v732_v21  ;;  %996 = vrot.lane.b32.xlu1 %v2166_v17, %s1976_s8 }
 0x15a   : > { %v858_v16 = vpop.permute.xlu0 %857 }
 0x15b   : > { %860 = vst.msk [vmem:[#allocation2 + $0x10] sm:$0x3] %vm747_vm8, %v858_v16  ;;  %v308_v29 = vpop.permute.xlu1 %307 }
 0x15c   : > { %1011 = vrot.lane.b32.xlu0 %v1010_v2, %s2627_s9  ;;  %310 = vst.msk [vmem:[#allocation2 + $0x8] sm:$0x3] %vm253_vm3, %v308_v29 }
 0x15d   : > { %1025 = vrot.lane.b32.xlu1 %v2166_v17, %s2624_s18 }
 0x15e   : > { %v322_v31 = vpop.permute.xlu0 %321 }
 0x15f   : > { %324 = vst.msk [vmem:[#allocation2 + $0x8] sm:$0xc] %vm268_vm4, %v322_v31  ;;  %v341_v33 = vpop.permute.xlu1 %340 }
 0x160   : > { %1039 = vrot.lane.b32.xlu0 %v1038_v4, %s1976_s8  ;;  %343 = vst.msk [vmem:[#allocation2 + $0xc] sm:$0xc] %vm268_vm4, %v341_v33  ;;  %s2533_s8 = scalar_lea.hbm %s2602_s4, %s1601_s26 }
 0x161   : > { %1122 = vrot.lane.b32.xlu1 %v2188_v25, %s1978_s5 }
 0x162   : > { %v984_v34 = vpop.permute.xlu0 %983 }
 0x163   : > { %986 = vst.msk [vmem:[#allocation2 + $0x10] sm:$0x3] %vm873_vm9, %v984_v34  ;;  %v423_v35 = vpop.permute.xlu1 %422 }
 0x164   : > { %1137 = vrot.lane.b32.xlu0 %v1136_v6, %s1977_s29  ;;  %425 = vst.msk [vmem:[#allocation2 + $0x8] sm:$0x3] %vm369_vm5, %v423_v35  ;;  %s1829_s29 = scalar_lea.vmem %s2535_s30, 128 }
 0x165   : > { %1151 = vrot.lane.b32.xlu1 %v2188_v25, %s2626_s27  ;;  %v1315_v25 = vld [vmem:[%s2601_s3] sm:$0xff]  ;;  %p1830_p7 = scmp.ne.s32.totalorder %s2535_s30, %s1829_s29  ;;  %s1981_s27 = smov [#allocation8]  }
 0x166   : > { %v437_v17 = vpop.permute.xlu0 %436  ;;  %s1833_s9 = sshll.u32 %s1981_s27, 4  ;;  %s1834_s9 = int_to_ptr.vmem [resolvable:$false] %s1833_s9 }
 0x167   : > { %439 = vst.msk [vmem:[#allocation2 + $0x8] sm:$0xc] %vm384_vm10, %v437_v17  ;;  %v453_v37 = vpop.permute.xlu1 %452  ;;  %p1831_p5 = pnand %p1830_p7, %p2089_p12  ;;  %s1835_s6 = scalar_lea.vmem %s1834_s9, 256 }
 0x168   : > { %1165 = vrot.lane.b32.xlu0 %v1164_v8, %s1978_s5  ;;  %455 = vst.msk [vmem:[#allocation2 + $0xc] sm:$0x3] %vm369_vm5, %v453_v37  ;;  %p1836_p9 = scmp.lt.s32.totalorder %s2535_s30, %s1834_s9  ;;  %p1837_p10 = scmp.lt.s32.totalorder %s1835_s6, %s1829_s29 }
 0x169   : > { %1311 = vperm.xlu1 %1764, %v1308_v38   ;;  %v1239_v38 = vld [vmem:[#allocation3] sm:$0xf]  ;;  %p1832_p8 = pneg %p1831_p5 }
 0x16a   : > { %v467_v40 = vpop.permute.xlu0 %466  ;;  %p1838_p3 = por %p1837_p10, %p1836_p9 }
 0x16b   : > { %469 = vst.msk [vmem:[#allocation2 + $0xc] sm:$0xc] %vm384_vm10, %v467_v40  ;;  %v1110_v41 = vpop.permute.xlu1 %1109 }
 0x16c   : > { %1112 = vst.msk [vmem:[#allocation2 + $0x10] sm:$0x3] %vm999_vm12, %v1110_v41  ;;  %1318 = vperm.xlu0 %1765, %v1315_v25   ;;  %p1839_p11 = pnand %p1838_p3, %p1832_p8 }
 0x16e   : > { %v549_v18 = vpop.permute.xlu0 %548 }
 0x16f   : > { %551 = vst.msk [vmem:[#allocation2 + $0x8] sm:$0x3] %vm495_vm6, %v549_v18  ;;  %v563_v42 = vpop.permute.xlu1 %562 }
 0x170   : > { %565 = vst.msk [vmem:[#allocation2 + $0x8] sm:$0xc] %vm510_vm13, %v563_v42 }
 0x172   : > { %v579_v43 = vpop.permute.xlu0 %578 }
 0x173   : > { %581 = vst.msk [vmem:[#allocation2 + $0xc] sm:$0x3] %vm495_vm6, %v579_v43  ;;  %v593_v44 = vpop.permute.xlu1 %592 }
 0x174   : > { %595 = vst.msk [vmem:[#allocation2 + $0xc] sm:$0xc] %vm510_vm13, %v593_v44 }
 0x176   : > { %v1236_v46 = vpop.permute.xlu0 %1235 }
 0x177   : > { %1238 = vst.msk [vmem:[#allocation2 + $0x10] sm:$0x3] %vm1125_vm14, %v1236_v46  ;;  %v675_v47 = vpop.permute.xlu1 %674 }
 0x178   : > { %677 = vst.msk [vmem:[#allocation2 + $0x8] sm:$0x3] %vm621_vm7, %v675_v47 }
 0x17a   : > { %v689_v49 = vpop.permute.xlu0 %688 }
 0x17b   : > { %691 = vst.msk [vmem:[#allocation2 + $0x8] sm:$0xc] %vm636_vm15, %v689_v49  ;;  %v705_v50 = vpop.permute.xlu1 %704 }
 0x17c   : > { %707 = vst.msk [vmem:[#allocation2 + $0xc] sm:$0x3] %vm621_vm7, %v705_v50 }
 0x17e   : > { %v719_v51 = vpop.permute.xlu0 %718  ;;  %v1797_v52 = vld [vmem:[#allocation2 + $0x10] ss:$0 sps:$4 sm:$0x33]  }
 0x17f   : > { %721 = vst.msk [vmem:[#allocation2 + $0xc] sm:$0xc] %vm636_vm15, %v719_v51  ;;  %v266_v53 = vpop.permute.xlu1 %265  ;;  %v1266_v54 = vsel %vm1264_vm0, %v1797_v52, 0 }
 0x180   : > { %269 = vst.msk [vmem:[#allocation2] sm:$0xc] %vm268_vm4, %v266_v53  ;;  %1619 = vmatpush3.bf16.msra.mxu0 %v1266_v54  ;;  %vm1140_vm4 = vcmask 1044354  }
 0x181   : > { %1620 = vmatprep.subr.bf16.mxu0 %v1967_v56 }
 0x182   : > { %v280_v55 = vpop.permute.xlu0 %279 }
 0x183   : > { %282 = vst.msk [vmem:[#allocation2 + $0x4] sm:$0x3] %vm253_vm3, %v280_v55  ;;  %v801_v57 = vpop.permute.xlu1 %800  ;;  %vm1014_vm3 = vcmask 913154  }
 0x184   : > { %803 = vst.msk [vmem:[#allocation2 + $0x8] sm:$0x3] %vm747_vm8, %v801_v57 }
 0x186   : > { %v815_v58 = vpop.permute.xlu0 %814 }
 0x187   : > { %817 = vst.msk [vmem:[#allocation2 + $0x8] sm:$0xc] %vm762_vm1, %v815_v58  ;;  %v831_v60 = vpop.permute.xlu1 %830 }
 0x188   : > { %833 = vst.msk [vmem:[#allocation2 + $0xc] sm:$0x3] %vm747_vm8, %v831_v60 }
 0x18a   : > { %v845_v61 = vpop.permute.xlu0 %844 }
 0x18b   : > { %847 = vst.msk [vmem:[#allocation2 + $0xc] sm:$0xc] %vm762_vm1, %v845_v61  ;;  %v367_v62 = vpop.permute.xlu1 %366 }
 0x18c   : > { %370 = vst.msk [vmem:[#allocation2] sm:$0x3] %vm369_vm5, %v367_v62 }
 0x18e   : > { %v382_v63 = vpop.permute.xlu0 %381 }
 0x18f   : > { %385 = vst.msk [vmem:[#allocation2] sm:$0xc] %vm384_vm10, %v382_v63  ;;  %v396_v0 = vpop.permute.xlu1 %395 }
 0x190   : > { %398 = vst.msk [vmem:[#allocation2 + $0x4] sm:$0x3] %vm369_vm5, %v396_v0  ;;  %vm1260_vm5 = vcmask 293888  }
 0x192   : > { %v410_v1 = vpop.permute.xlu0 %409 }
 0x193   : > { %412 = vst.msk [vmem:[#allocation2 + $0x4] sm:$0xc] %vm384_vm10, %v410_v1  ;;  %v927_v2 = vpop.permute.xlu1 %926 }
 0x194   : > { %929 = vst.msk [vmem:[#allocation2 + $0x8] sm:$0x3] %vm873_vm9, %v927_v2 }
 0x196   : > { %v941_v3 = vpop.permute.xlu0 %940 }
 0x197   : > { %943 = vst.msk [vmem:[#allocation2 + $0x8] sm:$0xc] %vm888_vm2, %v941_v3  ;;  %v957_v4 = vpop.permute.xlu1 %956 }
 0x198   : > { %959 = vst.msk [vmem:[#allocation2 + $0xc] sm:$0x3] %vm873_vm9, %v957_v4 }
 0x19a   : > { %v971_v5 = vpop.permute.xlu0 %970 }
 0x19b   : > { %973 = vst.msk [vmem:[#allocation2 + $0xc] sm:$0xc] %vm888_vm2, %v971_v5  ;;  %v493_v6 = vpop.permute.xlu1 %492 }
 0x19c   : > { %496 = vst.msk [vmem:[#allocation2] sm:$0x3] %vm495_vm6, %v493_v6 }
 0x19e   : > { %v508_v7 = vpop.permute.xlu0 %507 }
 0x19f   : > { %511 = vst.msk [vmem:[#allocation2] sm:$0xc] %vm510_vm13, %v508_v7  ;;  %v522_v8 = vpop.permute.xlu1 %521 }
 0x1a0   : > { %524 = vst.msk [vmem:[#allocation2 + $0x4] sm:$0x3] %vm495_vm6, %v522_v8 }
 0x1a2   : > { %v536_v9 = vpop.permute.xlu0 %535 }
 0x1a3   : > { %538 = vst.msk [vmem:[#allocation2 + $0x4] sm:$0xc] %vm510_vm13, %v536_v9  ;;  %v1053_v10 = vpop.permute.xlu1 %1052 }
 0x1a4   : > { %1055 = vst.msk [vmem:[#allocation2 + $0x8] sm:$0x3] %vm999_vm12, %v1053_v10 }
 0x1a6   : > { %v1067_v13 = vpop.permute.xlu0 %1066 }
 0x1a7   : > { %1069 = vst.msk [vmem:[#allocation2 + $0x8] sm:$0xc] %vm1014_vm3, %v1067_v13  ;;  %v1083_v14 = vpop.permute.xlu1 %1082 }
 0x1a8   : > { %1085 = vst.msk [vmem:[#allocation2 + $0xc] sm:$0x3] %vm999_vm12, %v1083_v14 }
 0x1aa   : > { %v1097_v19 = vpop.permute.xlu0 %1096 }
 0x1ab   : > { %1099 = vst.msk [vmem:[#allocation2 + $0xc] sm:$0xc] %vm1014_vm3, %v1097_v19  ;;  %v619_v20 = vpop.permute.xlu1 %618 }
 0x1ac   : > { %622 = vst.msk [vmem:[#allocation2] sm:$0x3] %vm621_vm7, %v619_v20 }
 0x1ae   : > { %v634_v22 = vpop.permute.xlu0 %633 }
 0x1af   : > { %637 = vst.msk [vmem:[#allocation2] sm:$0xc] %vm636_vm15, %v634_v22  ;;  %v648_v23 = vpop.permute.xlu1 %647 }
 0x1b0   : > { %650 = vst.msk [vmem:[#allocation2 + $0x4] sm:$0x3] %vm621_vm7, %v648_v23 }
 0x1b2   : > { %v662_v24 = vpop.permute.xlu0 %661 }
 0x1b3   : > { %664 = vst.msk [vmem:[#allocation2 + $0x4] sm:$0xc] %vm636_vm15, %v662_v24  ;;  %v1179_v26 = vpop.permute.xlu1 %1178 }
 0x1b4   : > { %1181 = vst.msk [vmem:[#allocation2 + $0x8] sm:$0x3] %vm1125_vm14, %v1179_v26 }
 0x1b6   : > { %v1193_v27 = vpop.permute.xlu0 %1192 }
 0x1b7   : > { %1195 = vst.msk [vmem:[#allocation2 + $0x8] sm:$0xc] %vm1140_vm4, %v1193_v27  ;;  %v1209_v28 = vpop.permute.xlu1 %1208 }
 0x1b8   : > { %1211 = vst.msk [vmem:[#allocation2 + $0xc] sm:$0x3] %vm1125_vm14, %v1209_v28 }
 0x1ba   : > { %v1223_v30 = vpop.permute.xlu0 %1222 }
 0x1bb   : > { %1225 = vst.msk [vmem:[#allocation2 + $0xc] sm:$0xc] %vm1140_vm4, %v1223_v30  ;;  %v745_v32 = vpop.permute.xlu1 %744 }
 0x1bc   : > { %748 = vst.msk [vmem:[#allocation2] sm:$0x3] %vm747_vm8, %v745_v32 }
 0x1be   : > { %v760_v36 = vpop.permute.xlu0 %759 }
 0x1bf   : > { %763 = vst.msk [vmem:[#allocation2] sm:$0xc] %vm762_vm1, %v760_v36  ;;  %v774_v45 = vpop.permute.xlu1 %773 }
 0x1c0   : > { %776 = vst.msk [vmem:[#allocation2 + $0x4] sm:$0x3] %vm747_vm8, %v774_v45 }
 0x1c2   : > { %v788_v48 = vpop.permute.xlu0 %787  ;;  %v1799_v59 = vld [vmem:[#allocation2 + $0x8] sm:$0xff]  }
 0x1c3   : > { %790 = vst.msk [vmem:[#allocation2 + $0x4] sm:$0xc] %vm762_vm1, %v788_v48  ;;  %v871_v11 = vpop.permute.xlu1 %870  ;;  %1621 = vmatpush3.bf16.msra.mxu0 %v1799_v59 }
 0x1c4   : > { %874 = vst.msk [vmem:[#allocation2] sm:$0x3] %vm873_vm9, %v871_v11  ;;  %1622 = vmatprep.subr.bf16.mxu0 %v1967_v56 }
 0x1c6   : > { %v886_v15 = vpop.permute.xlu0 %885 }
 0x1c7   : > { %889 = vst.msk [vmem:[#allocation2] sm:$0xc] %vm888_vm2, %v886_v15  ;;  %v900_v12 = vpop.permute.xlu1 %899 }
 0x1c8   : > { %902 = vst.msk [vmem:[#allocation2 + $0x4] sm:$0x3] %vm873_vm9, %v900_v12 }
 0x1ca   : > { %v914_v21 = vpop.permute.xlu0 %913 }
 0x1cb   : > { %916 = vst.msk [vmem:[#allocation2 + $0x4] sm:$0xc] %vm888_vm2, %v914_v21  ;;  %v997_v16 = vpop.permute.xlu1 %996 }
 0x1cc   : > { %1000 = vst.msk [vmem:[#allocation2] sm:$0x3] %vm999_vm12, %v997_v16 }
 0x1ce   : > { %v1012_v29 = vpop.permute.xlu0 %1011 }
 0x1cf   : > { %1015 = vst.msk [vmem:[#allocation2] sm:$0xc] %vm1014_vm3, %v1012_v29  ;;  %v1026_v31 = vpop.permute.xlu1 %1025 }
 0x1d0   : > { %1028 = vst.msk [vmem:[#allocation2 + $0x4] sm:$0x3] %vm999_vm12, %v1026_v31 }
 0x1d2   : > { %v1040_v56 = vpop.permute.xlu0 %1039 }
 0x1d3   : > { %1042 = vst.msk [vmem:[#allocation2 + $0x4] sm:$0xc] %vm1014_vm3, %v1040_v56  ;;  %v1123_v33 = vpop.permute.xlu1 %1122 }
 0x1d4   : > { %1126 = vst.msk [vmem:[#allocation2] sm:$0x3] %vm1125_vm14, %v1123_v33 }
 0x1d6   : > { %v1138_v34 = vpop.permute.xlu0 %1137 }
 0x1d7   : > { %1141 = vst.msk [vmem:[#allocation2] sm:$0xc] %vm1140_vm4, %v1138_v34  ;;  %v1152_v35 = vpop.permute.xlu1 %1151 }
 0x1d8   : > { %1154 = vst.msk [vmem:[#allocation2 + $0x4] sm:$0x3] %vm1125_vm14, %v1152_v35 }
 0x1da   : > { %v1166_v17 = vpop.permute.xlu0 %1165 }
 0x1db   : > { %1168 = vst.msk [vmem:[#allocation2 + $0x4] sm:$0xc] %vm1140_vm4, %v1166_v17 }
 0x1e2   : > { %v1800_v37 = vld [vmem:[#allocation2] sm:$0xff]  }
 0x1e3   : > { %1623 = vmatpush3.bf16.msra.mxu0 %v1800_v37 }
 0x1e4   : > { %v1312_v39 = vpop.permute.xlu1 %1311 }
 0x1e6   : > { %1625 = vmatmul.mubr.msk.bf16.vlgmr.msra.gmra.mxu0 %vm1260_vm5, %v1239_v38 }
 0x1e7   : > { %v1319_v40 = vpop.permute.xlu0 %1318 }
 0x2a6   : > { %v1302_v25 = vpop.f32.mrf.mxu0 }
 0x2a7   : > { %v1314_v41 = vmul.f32 %v1312_v39, %v1302_v25 }
 0x2a8   : > { %v1626_v18 = vpop.f32.mrf.mxu0 }
 0x2a9   : > { %v1321_v42 = vadd.f32 %v1319_v40, %v1314_v41 }
 0x2aa   : > { %v1305_v43 = vpop.f32.mrf.mxu0 }
 0x2ab   : > { %1322 = vst [vmem:[%s2629_s21] sm:$0xff] %v1321_v42 }
 0x2ac   : > { %v1627_v44 = vpop.f32.mrf.mxu0 }
 0x2ad   : > { %1842 = shalt.err (!%p1839_p11)
}
 0x2ae   : > { %s1843_s12 = scalar_lea.hbm %s2533_s8, 128  ;;  %s1847_s7 = scalar_lea.hbm %s2602_s4, 512 }
 0x2af   : > { %p1844_p13 = scmp.ne.s32.totalorder %s2533_s8, %s1843_s12  ;;  %p1848_p6 = scmp.lt.s32.totalorder %s2533_s8, %s2602_s4 }
 0x2b0   : > { %p1849_p4 = scmp.lt.s32.totalorder %s1847_s7, %s1843_s12 }
 0x2b1   : > { %p1845_p0 = pnand %p1844_p13, %p2089_p12 }
 0x2b2   : > { %p1850_p7 = por %p1849_p4, %p1848_p6 }
 0x2b3   : > { %p1846_p1 = pneg %p1845_p0 }
 0x2b5   : > { %p1851_p5 = pnand %p1850_p7, %p1846_p1 }
 0x2b7   : > { %1854 = shalt.err (!%p1851_p5)
}
 0x2b8   : > { %1633 = dma.vmem_to_hbm [thread:$0]  (%p2089_p12), %s2535_s30, 128, %s2533_s8, %s1324_s28  }
 0x2b9 PF: > { %p1644_p8 = scmp.ge.s32.totalorder %s1949_s25, 2  ;;  %s1351_s5 = sand.u32 1, %s1909_s15  }
 0x2ba   : > { %s1352_s18 = scalar_lea.sflag [#allocation7], %s1351_s5 }
 0x2bb   : > { %p1640_p9 = pnand %p1644_p8, %p2102_p2 }
 0x2bd   : > { %p1641_p10 = pneg %p1640_p9 }
 0x2bf   : > { %1904 = dma.done.wait (%p1641_p10), %s1352_s18, 128  }
 0x2c0   : > { %1906 = vsyncadd (%p1641_p10), %s1352_s18, 4294967168  ;;  %s20_s25 = sadd.s32 1, %s1949_s25   ;;  %s2631_s11 = sld [smem:[#allocation15_spill]] }
 0x2c1   : > { %p17_p3 = scmp.ge.s32.totalorder %s20_s25, 6   ;;  %s2632_s21 = sld [smem:[#allocation11_spill]] }
 0x2c2   : > { %s2633_s22 = sld [smem:[#allocation12_spill]]  ;;  %s2636_s15 = smov %s1913_s16 }
 0x2c3   : > { %s2634_s23 = sld [smem:[#allocation13_spill]]  ;;  %s2637_s16 = smov %s1917_s17 }
 0x2c4   : > { %s2635_s24 = sld [smem:[#allocation14_spill]]  ;;  %s2638_s17 = smov %s2097_s13 }
 0x2c5   : > { %s2639_s18 = smov %s1925_s19  ;;  %s2640_s19 = smov %s1929_s20 }
 0x2c6   : > { %s2641_s20 = smov %s2631_s11  ;;  %19 = sbr.rel (!%p17_p3) target bundleno = 9 (0x9), region = 95 }
 0x2cb   :  { %1357 = vsyncpa [#allocation6], 1 }
 0x2cc   :  { %1359 = vsyncpa [#allocation6 + $0x1], 1 }
 0x2cd   :  { %1360 = vsyncpa [#allocation7], 1 }
 0x2ce   :  { %1362 = vsyncpa [#allocation7 + $0x1], 1 }

</bundles_post_ra>
